<compile_context>
chip_gen: v7x
topology: tpu7x:2x2x1
jax: 0.10.0
libtpu: 0.0.40
codegen_flags: <defaults>
</compile_context>

<pallas_src>
import functools

import jax
import jax.numpy as jnp
from jax.experimental import pallas as pl
from jax.experimental.pallas import tpu as pltpu

LANE = 128          # pad all feature dims to the TPU lane width
NODE_PAD = 128      # pad the node dim to MXU-friendly multiples (>= bf16 sublane 16)
GRAPH_PAD = 16      # pad the graph dim to the bf16 sublane packing


def _pad2(x, rows, cols, dtype=None):
    dtype = x.dtype if dtype is None else dtype
    out = jnp.zeros((rows, cols), dtype)
    return out.at[: x.shape[0], : x.shape[1]].set(x.astype(dtype))


def _round_up(n, m):
    return ((n + m - 1) // m) * m


def _default_act_dtype():
    """bf16 activations on v6e/v7x (native bf16 VPU); f32 on v5e / unknown."""
    try:
        kind = jax.devices()[0].device_kind.lower()
    except Exception:
        return jnp.float32
    if "v5 lite" in kind or "v5e" in kind or "v5lite" in kind:
        return jnp.float32
    if "v6" in kind or "v7" in kind:
        return jnp.bfloat16
    return jnp.float32


# ---------------------------------------------------------------------------
# Fused Pallas kernel
# ---------------------------------------------------------------------------

def seal_gin_fused_kernel(a_ref, x_ref, w1_ref, b1_ref, w2_ref, b2_ref,
                          scale_ref, shift_ref, l1w_ref, l1b_ref,
                          l2w_ref, l2b_ref, batch_ref, invc_ref, o_ref,
                          *, num_layers, act_dtype):
    h = x_ref[...]                                   # [Np, 128] act_dtype
    z = jnp.zeros(h.shape, jnp.float32)              # f32 JK accumulator (concat @ W1)

    for l in range(num_layers):                      # static unroll (static weight index)
        # GIN sum aggregation, self-loop folded into A_hat (eps=0, train_eps=False).
        # Re-read a_ref per layer instead of pinning one value across the unroll.
        agg = jnp.dot(a_ref[...], h.astype(jnp.bfloat16),
                      preferred_element_type=jnp.float32)
        # MLP: Linear -> ReLU -> Linear -> ReLU  (bf16 MXU, f32 accumulate/elementwise)
        t = jnp.dot(agg.astype(jnp.bfloat16), w1_ref[l],
                    preferred_element_type=jnp.float32) + b1_ref[l]
        t = jnp.maximum(t, 0.0)
        t = jnp.dot(t.astype(jnp.bfloat16), w2_ref[l],
                    preferred_element_type=jnp.float32) + b2_ref[l]
        t = jnp.maximum(t, 0.0)
        # BatchNorm1d (eval) folded to affine; inter-layer h kept in act_dtype.
        h = (t * scale_ref[l] + shift_ref[l]).astype(act_dtype)
        # JK contribution: xs_l @ lin1_w[l*H:(l+1)*H, :]
        z = z + jnp.dot(h.astype(jnp.bfloat16), l1w_ref[l],
                        preferred_element_type=jnp.float32)

    # global_mean_pool: binary [Gp, Np] pooling matrix built in-kernel from batch
    # ids; 1/count scaling applied AFTER the matmul (a [Gp, 128] multiply).
    g_pad = invc_ref.shape[0]
    n_pad = batch_ref.shape[1]
    g_idx = jax.lax.broadcasted_iota(jnp.int32, (g_pad, n_pad), 0)
    pool01 = (batch_ref[...] == g_idx).astype(jnp.bfloat16)

    pooled = (jnp.dot(pool01, z.astype(jnp.bfloat16),
                      preferred_element_type=jnp.float32)
              * invc_ref[...]) + l1b_ref[...]
    hidden = jnp.maximum(pooled, 0.0)
    # F.dropout(training=False) is identity.
    o_ref[...] = (jnp.dot(hidden.astype(jnp.bfloat16), l2w_ref[...],
                          preferred_element_type=jnp.float32) + l2b_ref[...])


# ---------------------------------------------------------------------------
# Parameter init (mirrors module shapes; use_feature=False, node_embedding=None,
# jk=True, train_eps=False)
# ---------------------------------------------------------------------------

def init_params(key, hidden_channels, num_layers, max_z):
    keys = jax.random.split(key, 1 + 2 * num_layers + 2)
    k_iter = iter(keys)

    def lin(k, fan_in, fan_out):
        kw, kb = jax.random.split(k)
        bound = 1.0 / jnp.sqrt(fan_in)
        w = jax.random.uniform(kw, (fan_in, fan_out), jnp.float32, -bound, bound)
        b = jax.random.uniform(kb, (1, fan_out), jnp.float32, -bound, bound)
        return w, b

    params = {}
    params["z_emb"] = jax.random.normal(next(k_iter), (max_z, hidden_channels),
                                        jnp.float32)

    convs = []
    for _ in range(num_layers):  # conv1 + (num_layers - 1) convs share shapes here
        w1, b1 = lin(next(k_iter), hidden_channels, hidden_channels)
        w2, b2 = lin(next(k_iter), hidden_channels, hidden_channels)
        gamma = jnp.ones((1, hidden_channels), jnp.float32)
        beta = jnp.zeros((1, hidden_channels), jnp.float32)
        mean = jnp.zeros((1, hidden_channels), jnp.float32)
        var = jnp.ones((1, hidden_channels), jnp.float32)
        convs.append((w1, b1, w2, b2, gamma, beta, mean, var))
    params["convs"] = convs

    params["lin1_w"], params["lin1_b"] = lin(next(k_iter),
                                             num_layers * hidden_channels,
                                             hidden_channels)
    params["lin2_w"], params["lin2_b"] = lin(next(k_iter), hidden_channels, 1)
    return params


# ---------------------------------------------------------------------------
# Forward pass (wrapper: XLA glue for gather/scatter + padding, one pallas_call)
# ---------------------------------------------------------------------------

def seal_gin_forward(params, z, edge_index, batch, num_graphs, act_dtype=None):
    if act_dtype is None:
        act_dtype = _default_act_dtype()

    hidden = params["z_emb"].shape[1]
    num_layers = len(params["convs"])
    n = z.shape[0]
    n_pad = max(NODE_PAD, _round_up(n, NODE_PAD))          # lane/sublane-dense A rows
    g_pad = max(GRAPH_PAD, _round_up(num_graphs, GRAPH_PAD))

    # Embedding lookup (glue). (ndim==3 sum branch of the module is unused here.)
    x = params["z_emb"][z]                                   # [N, H]
    x = _pad2(x, n_pad, LANE, dtype=act_dtype)

    # A_hat = A + (1+eps)*I (eps=0): built DIRECTLY in bf16, self-loops in the
    # scatter, written straight into the padded [n_pad, n_pad] buffer.
    src, dst = edge_index[0], edge_index[1]
    self_idx = jnp.arange(n, dtype=jnp.int32)
    rows = jnp.concatenate([dst.astype(jnp.int32), self_idx])
    cols = jnp.concatenate([src.astype(jnp.int32), self_idx])
    a_hat = jnp.zeros((n_pad, n_pad), jnp.bfloat16).at[rows, cols].add(
        jnp.ones((rows.shape[0],), jnp.bfloat16))

    # Per-layer conv params: weights -> bf16 (MXU path), biases / folded-BN -> f32.
    w1s, b1s, w2s, b2s, scales, shifts = [], [], [], [], [], []
    for (w1, b1, w2, b2, gamma, beta, mean, var) in params["convs"]:
        scale = gamma * jax.lax.rsqrt(var + 1e-5)
        shift = beta - mean * scale
        w1s.append(_pad2(w1, LANE, LANE, jnp.bfloat16))
        b1s.append(_pad2(b1, 1, LANE))
        w2s.append(_pad2(w2, LANE, LANE, jnp.bfloat16))
        b2s.append(_pad2(b2, 1, LANE))
        scales.append(_pad2(scale, 1, LANE))
        shifts.append(_pad2(shift, 1, LANE))
    w1s, b1s = jnp.stack(w1s), jnp.stack(b1s)
    w2s, b2s = jnp.stack(w2s), jnp.stack(b2s)
    scales, shifts = jnp.stack(scales), jnp.stack(shifts)

    # lin1 split into per-JK-layer blocks (concat(xs) @ W1 == sum_l xs_l @ W1_l).
    l1 = params["lin1_w"].reshape(num_layers, hidden, hidden)
    l1ws = jnp.stack([_pad2(l1[l], LANE, LANE, jnp.bfloat16)
                      for l in range(num_layers)])
    l1b = _pad2(params["lin1_b"], 1, LANE)
    l2w = _pad2(params["lin2_w"], LANE, LANE, jnp.bfloat16)  # out dim padded 1 -> 128
    l2b = _pad2(params["lin2_b"], 1, LANE)

    # Mean-pool metadata (binary pool matrix is built inside the kernel).
    batch_ids = jnp.full((1, n_pad), -1, jnp.int32).at[0, :n].set(
        batch.astype(jnp.int32))
    counts = jnp.zeros((num_graphs,), jnp.float32).at[batch].add(1.0)
    inv_counts = 1.0 / jnp.maximum(counts, 1.0)   # empty graphs pool to 0 (not NaN)
    invc = jnp.zeros((g_pad, 1), jnp.float32).at[:num_graphs, 0].set(inv_counts)

    kernel = functools.partial(seal_gin_fused_kernel,
                               num_layers=num_layers, act_dtype=act_dtype)
    vmem = pl.BlockSpec(memory_space=pltpu.MemorySpace.VMEM)

    flops = (num_layers * (2 * n_pad * n_pad * LANE          # aggregation
                           + 3 * 2 * n_pad * LANE * LANE)    # w1, w2, JK-lin1 blocks
             + 2 * g_pad * n_pad * LANE                      # pooling
             + 2 * g_pad * LANE * LANE)                      # lin2
    bytes_accessed = (a_hat.size * 2 + x.size * x.dtype.itemsize
                      + (w1s.size + w2s.size + l1ws.size + l2w.size) * 2
                      + (b1s.size + b2s.size + scales.size + shifts.size
                         + l1b.size + l2b.size + invc.size) * 4
                      + batch_ids.size * 4 + g_pad * LANE * 4)

    out = pl.pallas_call(
        kernel,
        out_shape=jax.ShapeDtypeStruct((g_pad, LANE), jnp.float32),
        in_specs=[vmem] * 14,
        out_specs=vmem,
        cost_estimate=pl.CostEstimate(flops=flops, transcendentals=0,
                                      bytes_accessed=bytes_accessed),
    )(a_hat, x, w1s, b1s, w2s, b2s, scales, shifts, l1ws, l1b, l2w, l2b,
      batch_ids, invc)

    return out[:num_graphs, :1]   # strip lane / graph padding -> [G, 1]


# ---------------------------------------------------------------------------
# Main
# ---------------------------------------------------------------------------

if __name__ == "__main__":
    hidden_channels = 32
    num_layers = 3
    max_z = 10

    n_per_graph = 8
    num_graphs = 2
    n = n_per_graph * num_graphs

    key = jax.random.PRNGKey(0)
    k_params, k_z = jax.random.split(key)

    params = init_params(k_params, hidden_channels, num_layers, max_z)

    # Node structural labels z, batch assignment, ring edges per graph.
    z = jax.random.randint(k_z, (n,), 0, max_z, dtype=jnp.int32)
    batch = jnp.repeat(jnp.arange(num_graphs, dtype=jnp.int32), n_per_graph)

    src_list, dst_list = [], []
    for g in range(num_graphs):
        base = g * n_per_graph
        for i in range(n_per_graph):
            a_node = base + i
            b_node = base + (i + 1) % n_per_graph
            src_list += [a_node, b_node]
            dst_list += [b_node, a_node]
    edge_index = jnp.array([src_list, dst_list], dtype=jnp.int32)  # [2, E]

    out = seal_gin_forward(params, z, edge_index, batch, num_graphs)
    out = jax.block_until_ready(out)
    assert out.shape == (num_graphs, 1)
    print("KERNEL_OK")
</pallas_src>

<mosaic_0001>
module attributes {stable_mosaic.version = 11 : i64} {
  func.func @seal_gin_fused_kernel(%arg0: memref<128x128xbf16, #tpu.memory_space<vmem>>, %arg1: memref<128x128xf32, #tpu.memory_space<vmem>>, %arg2: memref<3x128x128xbf16, #tpu.memory_space<vmem>>, %arg3: memref<3x1x128xf32, #tpu.memory_space<vmem>>, %arg4: memref<3x128x128xbf16, #tpu.memory_space<vmem>>, %arg5: memref<3x1x128xf32, #tpu.memory_space<vmem>>, %arg6: memref<3x1x128xf32, #tpu.memory_space<vmem>>, %arg7: memref<3x1x128xf32, #tpu.memory_space<vmem>>, %arg8: memref<3x128x128xbf16, #tpu.memory_space<vmem>>, %arg9: memref<1x128xf32, #tpu.memory_space<vmem>>, %arg10: memref<128x128xbf16, #tpu.memory_space<vmem>>, %arg11: memref<1x128xf32, #tpu.memory_space<vmem>>, %arg12: memref<1x128xi32, #tpu.memory_space<vmem>>, %arg13: memref<16x1xf32, #tpu.memory_space<vmem>>, %arg14: memref<16x128xf32, #tpu.memory_space<vmem>>) attributes {dimension_semantics = [], scalar_prefetch = 0 : i64, scratch_operands = 0 : i64, tpu.core_type = #tpu.core_type<tc>} {
    %c0 = arith.constant 0 : index
    %c0_0 = arith.constant 0 : index
    %0 = vector.load %arg1[%c0, %c0_0] : memref<128x128xf32, #tpu.memory_space<vmem>>, vector<128x128xf32>
    %cst = arith.constant 0.000000e+00 : f32
    %1 = vector.broadcast %cst : f32 to vector<128x128xf32>
    %c0_1 = arith.constant 0 : index
    %c0_2 = arith.constant 0 : index
    %2 = vector.load %arg0[%c0_1, %c0_2] : memref<128x128xbf16, #tpu.memory_space<vmem>>, vector<128x128xbf16>
    %3 = arith.truncf %0 : vector<128x128xf32> to vector<128x128xbf16>
    %cst_3 = arith.constant dense<0.000000e+00> : vector<128x128xf32>
    %4 = tpu.matmul %2, %3, %cst_3 {dimension_numbers = #tpu.dot_dimension_numbers<[1], [0], [0], [1], [0, 0, 1, 1], [], []>} : vector<128x128xbf16>, vector<128x128xbf16>, vector<128x128xf32> -> vector<128x128xf32>
    %5 = arith.truncf %4 : vector<128x128xf32> to vector<128x128xbf16>
    %c0_4 = arith.constant 0 : index
    %c0_5 = arith.constant 0 : index
    %c0_6 = arith.constant 0 : index
    %6 = vector.load %arg2[%c0_4, %c0_5, %c0_6] : memref<3x128x128xbf16, #tpu.memory_space<vmem>>, vector<1x128x128xbf16>
    %7 = vector.shape_cast %6 : vector<1x128x128xbf16> to vector<128x128xbf16>
    %cst_7 = arith.constant dense<0.000000e+00> : vector<128x128xf32>
    %8 = tpu.matmul %5, %7, %cst_7 {dimension_numbers = #tpu.dot_dimension_numbers<[1], [0], [0], [1], [0, 0, 1, 1], [], []>} : vector<128x128xbf16>, vector<128x128xbf16>, vector<128x128xf32> -> vector<128x128xf32>
    %c0_8 = arith.constant 0 : index
    %c0_9 = arith.constant 0 : index
    %c0_10 = arith.constant 0 : index
    %9 = vector.load %arg3[%c0_8, %c0_9, %c0_10] : memref<3x1x128xf32, #tpu.memory_space<vmem>>, vector<1x1x128xf32>
    %10 = vector.shape_cast %9 : vector<1x1x128xf32> to vector<1x128xf32>
    %11 = vector.broadcast %10 : vector<1x128xf32> to vector<128x128xf32>
    %12 = arith.addf %8, %11 : vector<128x128xf32>
    %cst_11 = arith.constant 0.000000e+00 : f32
    %13 = vector.broadcast %cst_11 : f32 to vector<128x128xf32>
    %14 = arith.maximumf %12, %13 : vector<128x128xf32>
    %15 = arith.truncf %14 : vector<128x128xf32> to vector<128x128xbf16>
    %c0_12 = arith.constant 0 : index
    %c0_13 = arith.constant 0 : index
    %c0_14 = arith.constant 0 : index
    %16 = vector.load %arg4[%c0_12, %c0_13, %c0_14] : memref<3x128x128xbf16, #tpu.memory_space<vmem>>, vector<1x128x128xbf16>
    %17 = vector.shape_cast %16 : vector<1x128x128xbf16> to vector<128x128xbf16>
    %cst_15 = arith.constant dense<0.000000e+00> : vector<128x128xf32>
    %18 = tpu.matmul %15, %17, %cst_15 {dimension_numbers = #tpu.dot_dimension_numbers<[1], [0], [0], [1], [0, 0, 1, 1], [], []>} : vector<128x128xbf16>, vector<128x128xbf16>, vector<128x128xf32> -> vector<128x128xf32>
    %c0_16 = arith.constant 0 : index
    %c0_17 = arith.constant 0 : index
    %c0_18 = arith.constant 0 : index
    %19 = vector.load %arg5[%c0_16, %c0_17, %c0_18] : memref<3x1x128xf32, #tpu.memory_space<vmem>>, vector<1x1x128xf32>
    %20 = vector.shape_cast %19 : vector<1x1x128xf32> to vector<1x128xf32>
    %21 = vector.broadcast %20 : vector<1x128xf32> to vector<128x128xf32>
    %22 = arith.addf %18, %21 : vector<128x128xf32>
    %cst_19 = arith.constant 0.000000e+00 : f32
    %23 = vector.broadcast %cst_19 : f32 to vector<128x128xf32>
    %24 = arith.maximumf %22, %23 : vector<128x128xf32>
    %c0_20 = arith.constant 0 : index
    %c0_21 = arith.constant 0 : index
    %c0_22 = arith.constant 0 : index
    %25 = vector.load %arg6[%c0_20, %c0_21, %c0_22] : memref<3x1x128xf32, #tpu.memory_space<vmem>>, vector<1x1x128xf32>
    %26 = vector.shape_cast %25 : vector<1x1x128xf32> to vector<1x128xf32>
    %27 = vector.broadcast %26 : vector<1x128xf32> to vector<128x128xf32>
    %28 = arith.mulf %24, %27 : vector<128x128xf32>
    %c0_23 = arith.constant 0 : index
    %c0_24 = arith.constant 0 : index
    %c0_25 = arith.constant 0 : index
    %29 = vector.load %arg7[%c0_23, %c0_24, %c0_25] : memref<3x1x128xf32, #tpu.memory_space<vmem>>, vector<1x1x128xf32>
    %30 = vector.shape_cast %29 : vector<1x1x128xf32> to vector<1x128xf32>
    %31 = vector.broadcast %30 : vector<1x128xf32> to vector<128x128xf32>
    %32 = arith.addf %28, %31 : vector<128x128xf32>
    %33 = arith.truncf %32 : vector<128x128xf32> to vector<128x128xbf16>
    %c0_26 = arith.constant 0 : index
    %c0_27 = arith.constant 0 : index
    %c0_28 = arith.constant 0 : index
    %34 = vector.load %arg8[%c0_26, %c0_27, %c0_28] : memref<3x128x128xbf16, #tpu.memory_space<vmem>>, vector<1x128x128xbf16>
    %35 = vector.shape_cast %34 : vector<1x128x128xbf16> to vector<128x128xbf16>
    %cst_29 = arith.constant dense<0.000000e+00> : vector<128x128xf32>
    %36 = tpu.matmul %33, %35, %cst_29 {dimension_numbers = #tpu.dot_dimension_numbers<[1], [0], [0], [1], [0, 0, 1, 1], [], []>} : vector<128x128xbf16>, vector<128x128xbf16>, vector<128x128xf32> -> vector<128x128xf32>
    %37 = arith.addf %1, %36 : vector<128x128xf32>
    %c0_30 = arith.constant 0 : index
    %c0_31 = arith.constant 0 : index
    %38 = vector.load %arg0[%c0_30, %c0_31] : memref<128x128xbf16, #tpu.memory_space<vmem>>, vector<128x128xbf16>
    %39 = arith.truncf %32 : vector<128x128xf32> to vector<128x128xbf16>
    %cst_32 = arith.constant dense<0.000000e+00> : vector<128x128xf32>
    %40 = tpu.matmul %38, %39, %cst_32 {dimension_numbers = #tpu.dot_dimension_numbers<[1], [0], [0], [1], [0, 0, 1, 1], [], []>} : vector<128x128xbf16>, vector<128x128xbf16>, vector<128x128xf32> -> vector<128x128xf32>
    %41 = arith.truncf %40 : vector<128x128xf32> to vector<128x128xbf16>
    %c1 = arith.constant 1 : index
    %c0_33 = arith.constant 0 : index
    %c0_34 = arith.constant 0 : index
    %42 = vector.load %arg2[%c1, %c0_33, %c0_34] : memref<3x128x128xbf16, #tpu.memory_space<vmem>>, vector<1x128x128xbf16>
    %43 = vector.shape_cast %42 : vector<1x128x128xbf16> to vector<128x128xbf16>
    %cst_35 = arith.constant dense<0.000000e+00> : vector<128x128xf32>
    %44 = tpu.matmul %41, %43, %cst_35 {dimension_numbers = #tpu.dot_dimension_numbers<[1], [0], [0], [1], [0, 0, 1, 1], [], []>} : vector<128x128xbf16>, vector<128x128xbf16>, vector<128x128xf32> -> vector<128x128xf32>
    %c1_36 = arith.constant 1 : index
    %c0_37 = arith.constant 0 : index
    %c0_38 = arith.constant 0 : index
    %45 = vector.load %arg3[%c1_36, %c0_37, %c0_38] : memref<3x1x128xf32, #tpu.memory_space<vmem>>, vector<1x1x128xf32>
    %46 = vector.shape_cast %45 : vector<1x1x128xf32> to vector<1x128xf32>
    %47 = vector.broadcast %46 : vector<1x128xf32> to vector<128x128xf32>
    %48 = arith.addf %44, %47 : vector<128x128xf32>
    %cst_39 = arith.constant 0.000000e+00 : f32
    %49 = vector.broadcast %cst_39 : f32 to vector<128x128xf32>
    %50 = arith.maximumf %48, %49 : vector<128x128xf32>
    %51 = arith.truncf %50 : vector<128x128xf32> to vector<128x128xbf16>
    %c1_40 = arith.constant 1 : index
    %c0_41 = arith.constant 0 : index
    %c0_42 = arith.constant 0 : index
    %52 = vector.load %arg4[%c1_40, %c0_41, %c0_42] : memref<3x128x128xbf16, #tpu.memory_space<vmem>>, vector<1x128x128xbf16>
    %53 = vector.shape_cast %52 : vector<1x128x128xbf16> to vector<128x128xbf16>
    %cst_43 = arith.constant dense<0.000000e+00> : vector<128x128xf32>
    %54 = tpu.matmul %51, %53, %cst_43 {dimension_numbers = #tpu.dot_dimension_numbers<[1], [0], [0], [1], [0, 0, 1, 1], [], []>} : vector<128x128xbf16>, vector<128x128xbf16>, vector<128x128xf32> -> vector<128x128xf32>
    %c1_44 = arith.constant 1 : index
    %c0_45 = arith.constant 0 : index
    %c0_46 = arith.constant 0 : index
    %55 = vector.load %arg5[%c1_44, %c0_45, %c0_46] : memref<3x1x128xf32, #tpu.memory_space<vmem>>, vector<1x1x128xf32>
    %56 = vector.shape_cast %55 : vector<1x1x128xf32> to vector<1x128xf32>
    %57 = vector.broadcast %56 : vector<1x128xf32> to vector<128x128xf32>
    %58 = arith.addf %54, %57 : vector<128x128xf32>
    %cst_47 = arith.constant 0.000000e+00 : f32
    %59 = vector.broadcast %cst_47 : f32 to vector<128x128xf32>
    %60 = arith.maximumf %58, %59 : vector<128x128xf32>
    %c1_48 = arith.constant 1 : index
    %c0_49 = arith.constant 0 : index
    %c0_50 = arith.constant 0 : index
    %61 = vector.load %arg6[%c1_48, %c0_49, %c0_50] : memref<3x1x128xf32, #tpu.memory_space<vmem>>, vector<1x1x128xf32>
    %62 = vector.shape_cast %61 : vector<1x1x128xf32> to vector<1x128xf32>
    %63 = vector.broadcast %62 : vector<1x128xf32> to vector<128x128xf32>
    %64 = arith.mulf %60, %63 : vector<128x128xf32>
    %c1_51 = arith.constant 1 : index
    %c0_52 = arith.constant 0 : index
    %c0_53 = arith.constant 0 : index
    %65 = vector.load %arg7[%c1_51, %c0_52, %c0_53] : memref<3x1x128xf32, #tpu.memory_space<vmem>>, vector<1x1x128xf32>
    %66 = vector.shape_cast %65 : vector<1x1x128xf32> to vector<1x128xf32>
    %67 = vector.broadcast %66 : vector<1x128xf32> to vector<128x128xf32>
    %68 = arith.addf %64, %67 : vector<128x128xf32>
    %69 = arith.truncf %68 : vector<128x128xf32> to vector<128x128xbf16>
    %c1_54 = arith.constant 1 : index
    %c0_55 = arith.constant 0 : index
    %c0_56 = arith.constant 0 : index
    %70 = vector.load %arg8[%c1_54, %c0_55, %c0_56] : memref<3x128x128xbf16, #tpu.memory_space<vmem>>, vector<1x128x128xbf16>
    %71 = vector.shape_cast %70 : vector<1x128x128xbf16> to vector<128x128xbf16>
    %cst_57 = arith.constant dense<0.000000e+00> : vector<128x128xf32>
    %72 = tpu.matmul %69, %71, %cst_57 {dimension_numbers = #tpu.dot_dimension_numbers<[1], [0], [0], [1], [0, 0, 1, 1], [], []>} : vector<128x128xbf16>, vector<128x128xbf16>, vector<128x128xf32> -> vector<128x128xf32>
    %73 = arith.addf %37, %72 : vector<128x128xf32>
    %c0_58 = arith.constant 0 : index
    %c0_59 = arith.constant 0 : index
    %74 = vector.load %arg0[%c0_58, %c0_59] : memref<128x128xbf16, #tpu.memory_space<vmem>>, vector<128x128xbf16>
    %75 = arith.truncf %68 : vector<128x128xf32> to vector<128x128xbf16>
    %cst_60 = arith.constant dense<0.000000e+00> : vector<128x128xf32>
    %76 = tpu.matmul %74, %75, %cst_60 {dimension_numbers = #tpu.dot_dimension_numbers<[1], [0], [0], [1], [0, 0, 1, 1], [], []>} : vector<128x128xbf16>, vector<128x128xbf16>, vector<128x128xf32> -> vector<128x128xf32>
    %77 = arith.truncf %76 : vector<128x128xf32> to vector<128x128xbf16>
    %c2 = arith.constant 2 : index
    %c0_61 = arith.constant 0 : index
    %c0_62 = arith.constant 0 : index
    %78 = vector.load %arg2[%c2, %c0_61, %c0_62] : memref<3x128x128xbf16, #tpu.memory_space<vmem>>, vector<1x128x128xbf16>
    %79 = vector.shape_cast %78 : vector<1x128x128xbf16> to vector<128x128xbf16>
    %cst_63 = arith.constant dense<0.000000e+00> : vector<128x128xf32>
    %80 = tpu.matmul %77, %79, %cst_63 {dimension_numbers = #tpu.dot_dimension_numbers<[1], [0], [0], [1], [0, 0, 1, 1], [], []>} : vector<128x128xbf16>, vector<128x128xbf16>, vector<128x128xf32> -> vector<128x128xf32>
    %c2_64 = arith.constant 2 : index
    %c0_65 = arith.constant 0 : index
    %c0_66 = arith.constant 0 : index
    %81 = vector.load %arg3[%c2_64, %c0_65, %c0_66] : memref<3x1x128xf32, #tpu.memory_space<vmem>>, vector<1x1x128xf32>
    %82 = vector.shape_cast %81 : vector<1x1x128xf32> to vector<1x128xf32>
    %83 = vector.broadcast %82 : vector<1x128xf32> to vector<128x128xf32>
    %84 = arith.addf %80, %83 : vector<128x128xf32>
    %cst_67 = arith.constant 0.000000e+00 : f32
    %85 = vector.broadcast %cst_67 : f32 to vector<128x128xf32>
    %86 = arith.maximumf %84, %85 : vector<128x128xf32>
    %87 = arith.truncf %86 : vector<128x128xf32> to vector<128x128xbf16>
    %c2_68 = arith.constant 2 : index
    %c0_69 = arith.constant 0 : index
    %c0_70 = arith.constant 0 : index
    %88 = vector.load %arg4[%c2_68, %c0_69, %c0_70] : memref<3x128x128xbf16, #tpu.memory_space<vmem>>, vector<1x128x128xbf16>
    %89 = vector.shape_cast %88 : vector<1x128x128xbf16> to vector<128x128xbf16>
    %cst_71 = arith.constant dense<0.000000e+00> : vector<128x128xf32>
    %90 = tpu.matmul %87, %89, %cst_71 {dimension_numbers = #tpu.dot_dimension_numbers<[1], [0], [0], [1], [0, 0, 1, 1], [], []>} : vector<128x128xbf16>, vector<128x128xbf16>, vector<128x128xf32> -> vector<128x128xf32>
    %c2_72 = arith.constant 2 : index
    %c0_73 = arith.constant 0 : index
    %c0_74 = arith.constant 0 : index
    %91 = vector.load %arg5[%c2_72, %c0_73, %c0_74] : memref<3x1x128xf32, #tpu.memory_space<vmem>>, vector<1x1x128xf32>
    %92 = vector.shape_cast %91 : vector<1x1x128xf32> to vector<1x128xf32>
    %93 = vector.broadcast %92 : vector<1x128xf32> to vector<128x128xf32>
    %94 = arith.addf %90, %93 : vector<128x128xf32>
    %cst_75 = arith.constant 0.000000e+00 : f32
    %95 = vector.broadcast %cst_75 : f32 to vector<128x128xf32>
    %96 = arith.maximumf %94, %95 : vector<128x128xf32>
    %c2_76 = arith.constant 2 : index
    %c0_77 = arith.constant 0 : index
    %c0_78 = arith.constant 0 : index
    %97 = vector.load %arg6[%c2_76, %c0_77, %c0_78] : memref<3x1x128xf32, #tpu.memory_space<vmem>>, vector<1x1x128xf32>
    %98 = vector.shape_cast %97 : vector<1x1x128xf32> to vector<1x128xf32>
    %99 = vector.broadcast %98 : vector<1x128xf32> to vector<128x128xf32>
    %100 = arith.mulf %96, %99 : vector<128x128xf32>
    %c2_79 = arith.constant 2 : index
    %c0_80 = arith.constant 0 : index
    %c0_81 = arith.constant 0 : index
    %101 = vector.load %arg7[%c2_79, %c0_80, %c0_81] : memref<3x1x128xf32, #tpu.memory_space<vmem>>, vector<1x1x128xf32>
    %102 = vector.shape_cast %101 : vector<1x1x128xf32> to vector<1x128xf32>
    %103 = vector.broadcast %102 : vector<1x128xf32> to vector<128x128xf32>
    %104 = arith.addf %100, %103 : vector<128x128xf32>
    %105 = arith.truncf %104 : vector<128x128xf32> to vector<128x128xbf16>
    %c2_82 = arith.constant 2 : index
    %c0_83 = arith.constant 0 : index
    %c0_84 = arith.constant 0 : index
    %106 = vector.load %arg8[%c2_82, %c0_83, %c0_84] : memref<3x128x128xbf16, #tpu.memory_space<vmem>>, vector<1x128x128xbf16>
    %107 = vector.shape_cast %106 : vector<1x128x128xbf16> to vector<128x128xbf16>
    %cst_85 = arith.constant dense<0.000000e+00> : vector<128x128xf32>
    %108 = tpu.matmul %105, %107, %cst_85 {dimension_numbers = #tpu.dot_dimension_numbers<[1], [0], [0], [1], [0, 0, 1, 1], [], []>} : vector<128x128xbf16>, vector<128x128xbf16>, vector<128x128xf32> -> vector<128x128xf32>
    %109 = arith.addf %73, %108 : vector<128x128xf32>
    %110 = tpu.iota {dimensions = array<i32: 0>} : vector<16x128xi32>
    %c0_86 = arith.constant 0 : index
    %c0_87 = arith.constant 0 : index
    %111 = vector.load %arg12[%c0_86, %c0_87] : memref<1x128xi32, #tpu.memory_space<vmem>>, vector<1x128xi32>
    %112 = vector.broadcast %111 : vector<1x128xi32> to vector<16x128xi32>
    %113 = arith.cmpi eq, %112, %110 : vector<16x128xi32>
    %114 = arith.extui %113 : vector<16x128xi1> to vector<16x128xi32>
    %115 = arith.sitofp %114 : vector<16x128xi32> to vector<16x128xf32>
    %116 = arith.truncf %115 : vector<16x128xf32> to vector<16x128xbf16>
    %117 = arith.truncf %109 : vector<128x128xf32> to vector<128x128xbf16>
    %cst_88 = arith.constant dense<0.000000e+00> : vector<16x128xf32>
    %118 = tpu.matmul %116, %117, %cst_88 {dimension_numbers = #tpu.dot_dimension_numbers<[1], [0], [0], [1], [0, 0, 1, 1], [], []>} : vector<16x128xbf16>, vector<128x128xbf16>, vector<16x128xf32> -> vector<16x128xf32>
    %c0_89 = arith.constant 0 : index
    %c0_90 = arith.constant 0 : index
    %119 = vector.load %arg13[%c0_89, %c0_90] : memref<16x1xf32, #tpu.memory_space<vmem>>, vector<16x1xf32>
    %120 = vector.broadcast %119 : vector<16x1xf32> to vector<16x128xf32>
    %121 = arith.mulf %118, %120 : vector<16x128xf32>
    %c0_91 = arith.constant 0 : index
    %c0_92 = arith.constant 0 : index
    %122 = vector.load %arg9[%c0_91, %c0_92] : memref<1x128xf32, #tpu.memory_space<vmem>>, vector<1x128xf32>
    %123 = vector.broadcast %122 : vector<1x128xf32> to vector<16x128xf32>
    %124 = arith.addf %121, %123 : vector<16x128xf32>
    %cst_93 = arith.constant 0.000000e+00 : f32
    %125 = vector.broadcast %cst_93 : f32 to vector<16x128xf32>
    %126 = arith.maximumf %124, %125 : vector<16x128xf32>
    %127 = arith.truncf %126 : vector<16x128xf32> to vector<16x128xbf16>
    %c0_94 = arith.constant 0 : index
    %c0_95 = arith.constant 0 : index
    %128 = vector.load %arg10[%c0_94, %c0_95] : memref<128x128xbf16, #tpu.memory_space<vmem>>, vector<128x128xbf16>
    %cst_96 = arith.constant dense<0.000000e+00> : vector<16x128xf32>
    %129 = tpu.matmul %127, %128, %cst_96 {dimension_numbers = #tpu.dot_dimension_numbers<[1], [0], [0], [1], [0, 0, 1, 1], [], []>} : vector<16x128xbf16>, vector<128x128xbf16>, vector<16x128xf32> -> vector<16x128xf32>
    %c0_97 = arith.constant 0 : index
    %c0_98 = arith.constant 0 : index
    %130 = vector.load %arg11[%c0_97, %c0_98] : memref<1x128xf32, #tpu.memory_space<vmem>>, vector<1x128xf32>
    %131 = vector.broadcast %130 : vector<1x128xf32> to vector<16x128xf32>
    %132 = arith.addf %129, %131 : vector<16x128xf32>
    %c0_99 = arith.constant 0 : index
    %c0_100 = arith.constant 0 : index
    %133 = vector.load %arg14[%c0_99, %c0_100] : memref<16x128xf32, #tpu.memory_space<vmem>>, vector<16x128xf32>
    tpu.vector_store %arg14[%c0_99, %c0_100], %132 {strides = array<i32>} : memref<16x128xf32, #tpu.memory_space<vmem>>, vector<16x128xf32>,
    return
  }
}

</mosaic_0001>

<bundles_post_ra>
// kernel: tpu_custom_call.1
= control target key start
LH: loop header
LB: loop body
LE: loop exit
PB: predicated region body
PF: predicated region fallthrough
CT: control target
= control target key end

     0   :  { %19 = vsyncpa [#allocation3], 0  ;;  %s4136_s0 = inlined_call_operand.hbm [shape: bf16[128,128], index: 0, kind: input, shape index: {}]   ;;  %s4137_s1 = inlined_call_operand.hbm [shape: f32[128,128], index: 1, kind: input, shape index: {}]   ;;  %s4138_s2 = inlined_call_operand.hbm [shape: bf16[3,128,128], index: 2, kind: input, shape index: {}]   ;;  %s4139_s3 = inlined_call_operand.vmem [shape: f32[3,1,128], index: 3, kind: input, shape index: {}]   ;;  %s4140_s4 = inlined_call_operand.hbm [shape: bf16[3,128,128], index: 4, kind: input, shape index: {}]   ;;  %s4141_s5 = inlined_call_operand.vmem [shape: f32[3,1,128], index: 5, kind: input, shape index: {}]   ;;  %s4142_s6 = inlined_call_operand.vmem [shape: f32[3,1,128], index: 6, kind: input, shape index: {}]   ;;  %s4143_s7 = inlined_call_operand.vmem [shape: f32[3,1,128], index: 7, kind: input, shape index: {}]   ;;  %s4144_s8 = inlined_call_operand.hbm [shape: bf16[3,128,128], index: 8, kind: input, shape index: {}]   ;;  %s4145_s9 = inlined_call_operand.vmem [shape: f32[1,128], index: 9, kind: input, shape index: {}]   ;;  %s4146_s10 = inlined_call_operand.hbm [shape: bf16[128,128], index: 10, kind: input, shape index: {}]   ;;  %s4147_s11 = inlined_call_operand.vmem [shape: f32[1,128], index: 11, kind: input, shape index: {}]   ;;  %s4148_s12 = inlined_call_operand.vmem [shape: s32[1,128], index: 12, kind: input, shape index: {}]   ;;  %s4149_s13 = inlined_call_operand.vmem [shape: f32[16,1], index: 13, kind: input, shape index: {}]   ;;  %s4150_s14 = inlined_call_operand.hbm [shape: f32[16,128], index: 14, kind: output, shape index: {}]  }
   0x1   :  { %20 = vsyncpa [#allocation6], 0 }
   0x2   :  { %21 = vsyncpa [#allocation9], 0 }
   0x3   :  { %22 = vsyncpa [#allocation12], 0 }
   0x4   :  { %23 = vsyncpa [#allocation4], 0  ;;  %s3618_s29 = smov [#allocation5]   ;;  %s3454_s17 = scalar_lea.hbm %s4137_s1, 2048 }
   0x5   :  { %s41_s30 = sshll.u32 %s3618_s29, 4  ;;  %p3455_p0 = scmp.ne.s32.totalorder %s4137_s1, %s3454_s17  ;;  %s42_s30 = int_to_ptr.vmem [resolvable:$true] %s41_s30 }
   0x6   :  { %p3458_p1 = scmp.lt.u32.totalorder %s3454_s17, %s4137_s1 }
   0x8   :  { %p3460_p2 = pnand %p3458_p1, %p3455_p0 }
   0xa   :  { %3463 = shalt.err (!%p3460_p2)
}
   0xb   :  { %s3464_s22 = scalar_lea.vmem %s42_s30, 2048  ;;  %p3469_p4 = scmp.lt.s32.totalorder %s42_s30, %s42_s30 }
   0xc   :  { %p3465_p3 = scmp.ne.s32.totalorder %s42_s30, %s3464_s22  ;;  %p3470_p5 = scmp.lt.s32.totalorder %s3464_s22, %s3464_s22 }
   0xe   :  { %p3471_p6 = por %p3470_p5, %p3469_p4 }
  0x10   :  { %p3472_p7 = pnand %p3471_p6, %p3465_p3 }
  0x12   :  { %3475 = shalt.err (!%p3472_p7)
}
  0x13   :  { %s3619_s23 = smov 128   ;;  %s3620_s24 = smov 8  }
  0x14   :  { %47 = dma.hbm_to_vmem [thread:$0]  %s4137_s1, 2048, %s42_s30, [#allocation6], %s3619_s23, %s3619_s23, %s3620_s24  }
  0x15   :  { %s3621_s27 = smov [#allocation8]   ;;  %s3622_s29 = smov [#allocation2]  }
  0x16   :  { %s67_s28 = sshll.u32 %s3621_s27, 4  ;;  %s29_s15 = sshll.u32 %s3622_s29, 4  ;;  %s68_s28 = int_to_ptr.vmem [resolvable:$true] %s67_s28  ;;  %s30_s15 = int_to_ptr.vmem [resolvable:$true] %s29_s15 }
  0x17   :  { %s3476_s18 = scalar_lea.hbm %s4140_s4, 3072 }
  0x18   :  { %p3477_p8 = scmp.ne.s32.totalorder %s4140_s4, %s3476_s18  ;;  %p3480_p9 = scmp.lt.u32.totalorder %s3476_s18, %s4140_s4 }
  0x1a   :  { %p3482_p10 = pnand %p3480_p9, %p3477_p8 }
  0x1c   :  { %3485 = shalt.err (!%p3482_p10)
}
  0x1d   :  { %s3486_s1 = scalar_lea.vmem %s68_s28, 3072  ;;  %p3491_p12 = scmp.lt.s32.totalorder %s68_s28, %s68_s28 }
  0x1e   :  { %p3487_p11 = scmp.ne.s32.totalorder %s68_s28, %s3486_s1  ;;  %p3492_p13 = scmp.lt.s32.totalorder %s3486_s1, %s3486_s1 }
  0x20   :  { %p3493_p0 = por %p3492_p13, %p3491_p12 }
  0x22   :  { %p3494_p1 = pnand %p3493_p0, %p3487_p11 }
  0x24   :  { %3497 = shalt.err (!%p3494_p1)
}
  0x25   :  { %s3623_s30 = smov 64   ;;  %s3624_s25 = smov 4  }
  0x26   :  { %73 = dma.hbm_to_vmem [thread:$0]  %s4140_s4, 3072, %s68_s28, [#allocation9], %s3623_s30, %s3623_s30, %s3624_s25  }
  0x27   :  { %s3498_s17 = scalar_lea.hbm %s4136_s0, 1024 }
  0x28   :  { %p3499_p2 = scmp.ne.s32.totalorder %s4136_s0, %s3498_s17  ;;  %p3502_p3 = scmp.lt.u32.totalorder %s3498_s17, %s4136_s0 }
  0x2a   :  { %p3504_p4 = pnand %p3502_p3, %p3499_p2 }
  0x2c   :  { %3507 = shalt.err (!%p3504_p4)
}
  0x2d   :  { %s3508_s22 = scalar_lea.vmem %s30_s15, 1024  ;;  %p3513_p6 = scmp.lt.s32.totalorder %s30_s15, %s30_s15 }
  0x2e   :  { %p3509_p5 = scmp.ne.s32.totalorder %s30_s15, %s3508_s22  ;;  %p3514_p7 = scmp.lt.s32.totalorder %s3508_s22, %s3508_s22 }
  0x30   :  { %p3515_p8 = por %p3514_p7, %p3513_p6 }
  0x32   :  { %p3516_p9 = pnand %p3515_p8, %p3509_p5 }
  0x34   :  { %3519 = shalt.err (!%p3516_p9)
}
  0x35   :  { %35 = dma.hbm_to_vmem [thread:$0]  %s4136_s0, 1024, %s30_s15, [#allocation3], %s3623_s30, %s3623_s30, %s3624_s25  }
  0x36   :  { %s3625_s1 = smov [#allocation7]   ;;  %s3626_s27 = smov [#allocation10]  }
  0x37   :  { %s53_s26 = sshll.u32 %s3625_s1, 4  ;;  %s85_s29 = sshll.u32 %s3626_s27, 4  ;;  %s54_s26 = int_to_ptr.vmem [resolvable:$true] %s53_s26  ;;  %s86_s29 = int_to_ptr.vmem [resolvable:$true] %s85_s29 }
  0x38   :  { %s3520_s18 = scalar_lea.hbm %s4138_s2, 3072 }
  0x39   :  { %p3521_p10 = scmp.ne.s32.totalorder %s4138_s2, %s3520_s18  ;;  %p3524_p11 = scmp.lt.u32.totalorder %s3520_s18, %s4138_s2 }
  0x3b   :  { %p3526_p12 = pnand %p3524_p11, %p3521_p10 }
  0x3d   :  { %3529 = shalt.err (!%p3526_p12)
}
  0x3e   :  { %s3530_s0 = scalar_lea.vmem %s54_s26, 3072  ;;  %p3535_p0 = scmp.lt.s32.totalorder %s54_s26, %s54_s26 }
  0x3f   :  { %p3531_p13 = scmp.ne.s32.totalorder %s54_s26, %s3530_s0  ;;  %p3536_p1 = scmp.lt.s32.totalorder %s3530_s0, %s3530_s0 }
  0x41   :  { %p3537_p2 = por %p3536_p1, %p3535_p0 }
  0x43   :  { %p3538_p3 = pnand %p3537_p2, %p3531_p13 }
  0x45   :  { %3541 = shalt.err (!%p3538_p3)
}
  0x46   :  { %59 = dma.hbm_to_vmem [thread:$0]  %s4138_s2, 3072, %s54_s26, [#allocation6], %s3623_s30, %s3623_s30, %s3624_s25  }
  0x47   :  { %s3542_s27 = scalar_lea.hbm %s4144_s8, 3072 }
  0x48   :  { %p3543_p4 = scmp.ne.s32.totalorder %s4144_s8, %s3542_s27  ;;  %p3546_p5 = scmp.lt.u32.totalorder %s3542_s27, %s4144_s8 }
  0x4a   :  { %p3548_p6 = pnand %p3546_p5, %p3543_p4 }
  0x4c   :  { %3551 = shalt.err (!%p3548_p6)
}
  0x4d   :  { %s3552_s20 = scalar_lea.vmem %s86_s29, 3072  ;;  %p3557_p8 = scmp.lt.s32.totalorder %s86_s29, %s86_s29 }
  0x4e   :  { %p3553_p7 = scmp.ne.s32.totalorder %s86_s29, %s3552_s20  ;;  %p3558_p9 = scmp.lt.s32.totalorder %s3552_s20, %s3552_s20 }
  0x50   :  { %p3559_p10 = por %p3558_p9, %p3557_p8 }
  0x52   :  { %p3560_p11 = pnand %p3559_p10, %p3553_p7 }
  0x54   :  { %3563 = shalt.err (!%p3560_p11)
}
  0x55   :  { %91 = dma.hbm_to_vmem [thread:$0]  %s4144_s8, 3072, %s86_s29, [#allocation9], %s3623_s30, %s3623_s30, %s3624_s25  }
  0x56   :  { %s3627_s21 = smov [#allocation11]   ;;  %s3564_s4 = scalar_lea.hbm %s4146_s10, 1024 }
  0x57   :  { %s99_s22 = sshll.u32 %s3627_s21, 4  ;;  %p3565_p12 = scmp.ne.s32.totalorder %s4146_s10, %s3564_s4  ;;  %s100_s22 = int_to_ptr.vmem [resolvable:$true] %s99_s22 }
  0x58   :  { %p3568_p13 = scmp.lt.u32.totalorder %s3564_s4, %s4146_s10 }
  0x5a   :  { %p3570_p0 = pnand %p3568_p13, %p3565_p12 }
  0x5c   :  { %3573 = shalt.err (!%p3570_p0)
}
  0x5d   :  { %s3574_s17 = scalar_lea.vmem %s100_s22, 1024  ;;  %p3579_p2 = scmp.lt.s32.totalorder %s100_s22, %s100_s22 }
  0x5e   :  { %p3575_p1 = scmp.ne.s32.totalorder %s100_s22, %s3574_s17  ;;  %p3580_p3 = scmp.lt.s32.totalorder %s3574_s17, %s3574_s17 }
  0x60   :  { %p3581_p4 = por %p3580_p3, %p3579_p2 }
  0x62   :  { %p3582_p5 = pnand %p3581_p4, %p3575_p1 }
  0x64   :  { %3585 = shalt.err (!%p3582_p5)
}
  0x65   :  { %105 = dma.hbm_to_vmem [thread:$0]  %s4146_s10, 1024, %s100_s22, [#allocation12], %s3623_s30, %s3623_s30, %s3624_s25  }
  0x66   :  { %3608 = dma.done.wait [#allocation3], 1024  }
  0x67   :  { %3609 = vsyncadd [#allocation3], 4294966272 }
  0x68   :  { %3610 = dma.done.wait [#allocation6], 5120  }
  0x69   :  { %3611 = vsyncadd [#allocation6], 4294962176 }
  0x6a   :  { %3612 = dma.done.wait [#allocation9], 6144  }
  0x6b   :  { %3613 = vsyncadd [#allocation9], 4294961152 }
  0x6c   :  { %3614 = dma.done.wait [#allocation12], 1024  }
  0x6d   :  { %3615 = vsyncadd [#allocation12], 4294966272  ;;  %v131_v0 = vld [vmem:[#allocation5] sm:$0xff]  ;;  %v132_v1 = vld [vmem:[#allocation5 + $0x8] sm:$0xff]  ;;  %vm3629_vm0 = vmmov 0   ;;  %s3632_s21 = smov [#allocation13]  }
  0x6e   :  { %v133_v2 = vld [vmem:[#allocation5 + $0x10] sm:$0xff]  ;;  %v163_v3 = vpack.c.bf16 %v132_v1, %v131_v0  ;;  %v134_v4 = vld [vmem:[#allocation5 + $0x18] sm:$0xff]  ;;  %v135_v6 = vld [vmem:[#allocation5 + $0x20] sm:$0xff]  ;;  %s2546_s22 = sshll.u32 %s3632_s21, 4  ;;  %s2547_s22 = int_to_ptr.vmem [resolvable:$true] %s2546_s22 }
  0x6f   :  { %v164_v5 = vpack.c.bf16 %v134_v4, %v133_v2  ;;  %v136_v7 = vld [vmem:[#allocation5 + $0x28] sm:$0xff]  ;;  %v137_v8 = vld [vmem:[#allocation5 + $0x30] sm:$0xff]  ;;  %v138_v10 = vld [vmem:[#allocation5 + $0x38] sm:$0xff]  ;;  %p3591_p7 = scmp.lt.s32.totalorder %s2547_s22, %s2547_s22 }
  0x70   :  { %2886 = vmatprep.subr.bf16.mxu0 %v163_v3  ;;  %v165_v9 = vpack.c.bf16 %v136_v7, %v135_v6  ;;  %v3798_v11 = vld [vmem:[#allocation2] sm:$0xff]   ;;  %v166_v12 = vpack.c.bf16 %v138_v10, %v137_v8  ;;  %v140_v14 = vld [vmem:[#allocation5 + $0x48] sm:$0xff]  ;;  %v141_v15 = vld [vmem:[#allocation5 + $0x50] sm:$0xff] }
  0x71   :  { %2887 = vmatpush3.bf16.msra.mxu0 %v163_v3  ;;  %2902 = vmatprep.mubr.bf16.mxu0 %v3798_v11  ;;  %v139_v13 = vld [vmem:[#allocation5 + $0x40] sm:$0xff]  ;;  %v142_v17 = vld [vmem:[#allocation5 + $0x58] sm:$0xff]  ;;  %v3367_v19 = vld [vmem:[#allocation7 + $0x8] sm:$0xff]  }
  0x72   :  { %2888 = vmatprep.subr.bf16.mxu0 %v164_v5  ;;  %v167_v16 = vpack.c.bf16 %v140_v14, %v139_v13  ;;  %v3366_v18 = vld [vmem:[#allocation7] sm:$0xff]   ;;  %v168_v21 = vpack.c.bf16 %v142_v17, %v141_v15  ;;  %v144_v22 = vld [vmem:[#allocation5 + $0x68] sm:$0xff]  ;;  %v3368_v23 = vld [vmem:[#allocation7 + $0x10] sm:$0xff]  }
  0x73   :  { %v143_v20 = vld [vmem:[#allocation5 + $0x60] sm:$0xff]  ;;  %2918 = vmatprep.subr.bf16.mxu1 %v3366_v18  ;;  %v145_v24 = vld [vmem:[#allocation5 + $0x70] sm:$0xff]  ;;  %v146_v25 = vld [vmem:[#allocation5 + $0x78] sm:$0xff] }
  0x74   :  { %2919 = vmatpush3.bf16.msra.mxu1 %v3366_v18  ;;  %v3369_v26 = vld [vmem:[#allocation7 + $0x18] sm:$0xff]   ;;  %v169_v27 = vpack.c.bf16 %v144_v22, %v143_v20  ;;  %v3370_v28 = vld [vmem:[#allocation7 + $0x20] sm:$0xff]   ;;  %v170_v29 = vpack.c.bf16 %v146_v25, %v145_v24  ;;  %v3371_v30 = vld [vmem:[#allocation7 + $0x28] sm:$0xff]  }
  0x75   :  { %2889 = vmatpush3.bf16.msra.mxu0 %v164_v5  ;;  %2920 = vmatprep.subr.bf16.mxu1 %v3367_v19  ;;  %v3801_v31 = vld [vmem:[#allocation2 + $0x8] sm:$0xff]   ;;  %v3803_v32 = vld [vmem:[#allocation2 + $0x10] sm:$0xff]   ;;  %v3807_v34 = vld [vmem:[#allocation2 + $0x18] sm:$0xff]  }
  0x76   :  { %2890 = vmatprep.subr.bf16.mxu0 %v165_v9  ;;  %v3372_v33 = vld [vmem:[#allocation7 + $0x30] sm:$0xff]   ;;  %v3809_v35 = vld [vmem:[#allocation2 + $0x20] sm:$0xff]   ;;  %v3813_v36 = vld [vmem:[#allocation2 + $0x28] sm:$0xff]  }
  0x77   :  { %v3815_v37 = vld [vmem:[#allocation2 + $0x30] sm:$0xff]   ;;  %v3819_v38 = vld [vmem:[#allocation2 + $0x38] sm:$0xff]   ;;  %v3374_v40 = vld [vmem:[#allocation8] sm:$0xff]  }
  0x78   :  { %2921 = vmatpush3.bf16.msra.mxu1 %v3367_v19  ;;  %v3373_v39 = vld [vmem:[#allocation7 + $0x38] sm:$0xff]   ;;  %v3375_v41 = vld [vmem:[#allocation8 + $0x8] sm:$0xff]   ;;  %v3376_v42 = vld [vmem:[#allocation8 + $0x10] sm:$0xff]  }
  0x79   :  { %2891 = vmatpush3.bf16.msra.mxu0 %v165_v9  ;;  %2922 = vmatprep.subr.bf16.mxu1 %v3368_v23  ;;  %v3377_v43 = vld [vmem:[#allocation8 + $0x18] sm:$0xff]   ;;  %v3378_v44 = vld [vmem:[#allocation8 + $0x20] sm:$0xff]   ;;  %v3379_v45 = vld [vmem:[#allocation8 + $0x28] sm:$0xff]  }
  0x7a   :  { %2892 = vmatprep.subr.bf16.mxu0 %v166_v12  ;;  %v3380_v6 = vld [vmem:[#allocation8 + $0x30] sm:$0xff]   ;;  %v3381_v7 = vld [vmem:[#allocation8 + $0x38] sm:$0xff]   ;;  %v2569_v8 = vld [vmem:[%s4139_s3] ss:$0 sm:$0xff] }
  0x7c   :  { %2923 = vmatpush3.bf16.msra.mxu1 %v3368_v23 }
  0x7d   :  { %2893 = vmatpush3.bf16.msra.mxu0 %v166_v12  ;;  %2924 = vmatprep.subr.bf16.mxu1 %v3369_v26 }
  0x7e   :  { %2894 = vmatprep.subr.bf16.mxu0 %v167_v16 }
  0x80   :  { %2925 = vmatpush3.bf16.msra.mxu1 %v3369_v26 }
  0x81   :  { %2895 = vmatpush3.bf16.msra.mxu0 %v167_v16  ;;  %2926 = vmatprep.subr.bf16.mxu1 %v3370_v28 }
  0x82   :  { %2896 = vmatprep.subr.bf16.mxu0 %v168_v21 }
  0x84   :  { %2927 = vmatpush3.bf16.msra.mxu1 %v3370_v28 }
  0x85   :  { %2897 = vmatpush3.bf16.msra.mxu0 %v168_v21  ;;  %2928 = vmatprep.subr.bf16.mxu1 %v3371_v30 }
  0x86   :  { %2898 = vmatprep.subr.bf16.mxu0 %v169_v27 }
  0x88   :  { %2929 = vmatpush3.bf16.msra.mxu1 %v3371_v30 }
  0x89   :  { %2899 = vmatpush3.bf16.msra.mxu0 %v169_v27  ;;  %2930 = vmatprep.subr.bf16.mxu1 %v3372_v33 }
  0x8a   :  { %2900 = vmatprep.subr.bf16.mxu0 %v170_v29 }
  0x8c   :  { %2931 = vmatpush3.bf16.msra.mxu1 %v3372_v33 }
  0x8d   :  { %2901 = vmatpush3.bf16.msra.mxu0 %v170_v29  ;;  %2932 = vmatprep.subr.bf16.mxu1 %v3373_v39 }
  0x8e   :  { %2950 = vmatprep.subr.bf16.mxu0 %v3374_v40 }
  0x90   :  { %2903 = vmatmul.mubr.bf16.vlgmr.msra.gmra.mrb[0].mxu0 %v3801_v31  ;;  %2933 = vmatpush3.bf16.msra.mxu1 %v3373_v39 }
  0x91   :  { %2906 = vmatprep.mubr.bf16.mxu0 %v3803_v32  ;;  %2951 = vmatpush3.bf16.msra.mxu0 %v3374_v40 }
  0x92   :  { %2952 = vmatprep.subr.bf16.mxu0 %v3375_v41 }
  0x95   :  { %2953 = vmatpush3.bf16.msra.mxu0 %v3375_v41 }
  0x96   :  { %2954 = vmatprep.subr.bf16.mxu0 %v3376_v42 }
  0x98   :  { %2907 = vmatmul.mubr.bf16.gmra.mrb[4].mxu0 %v3807_v34 }
  0x99   :  { %2910 = vmatprep.mubr.bf16.mxu0 %v3809_v35  ;;  %2955 = vmatpush3.bf16.msra.mxu0 %v3376_v42 }
  0x9a   :  { %2956 = vmatprep.subr.bf16.mxu0 %v3377_v43 }
  0x9d   :  { %2957 = vmatpush3.bf16.msra.mxu0 %v3377_v43 }
  0x9e   :  { %2958 = vmatprep.subr.bf16.mxu0 %v3378_v44 }
  0xa0   :  { %2911 = vmatmul.mubr.bf16.gmra.mrb[8].mxu0 %v3813_v36 }
  0xa1   :  { %2914 = vmatprep.mubr.bf16.mxu0 %v3815_v37  ;;  %2959 = vmatpush3.bf16.msra.mxu0 %v3378_v44 }
  0xa2   :  { %2960 = vmatprep.subr.bf16.mxu0 %v3379_v45 }
  0xa5   :  { %2961 = vmatpush3.bf16.msra.mxu0 %v3379_v45 }
  0xa6   :  { %2962 = vmatprep.subr.bf16.mxu0 %v3380_v6 }
  0xa8   :  { %2915 = vmatmul.mubr.bf16.gmra.mrb[12].mxu0 %v3819_v38 }
  0xa9   :  { %2963 = vmatpush3.bf16.msra.mxu0 %v3380_v6 }
  0xaa   :  { %2964 = vmatprep.subr.bf16.mxu0 %v3381_v7 }
  0xad   :  { %2965 = vmatpush3.bf16.msra.mxu0 %v3381_v7 }
 0x163   :  { %v2904_v46 = vpop.f32.mrb[0].mxu0 }
 0x164   :  { %v253_v47 = vpop.f32.mrb[1].mxu0 }
 0x165   :  { %v2905_v48 = vpop.f32.mrb[2].mxu0 }
 0x166   :  { %v317_v49 = vpack.c.bf16 %v2905_v48, %v2904_v46  ;;  %v256_v50 = vpop.f32.mrb[3].mxu0 }
 0x167   :  { %v316_v51 = vpack.c.bf16 %v256_v50, %v253_v47 }
 0x169   :  { %2934 = vmatprep.mubr.bf16.mxu1 %v316_v51 }
 0x16a   :  { %2935 = vmatmul.mubr.bf16.vlgmr.msra.gmra.mrb[0].mxu1 %v317_v49 }
 0x16b   :  { %v2908_v52 = vpop.f32.mrb[4].mxu0 }
 0x16c   :  { %v269_v53 = vpop.f32.mrb[5].mxu0 }
 0x16d   :  { %v2909_v54 = vpop.f32.mrb[6].mxu0 }
 0x16e   :  { %v319_v55 = vpack.c.bf16 %v2909_v54, %v2908_v52  ;;  %v272_v56 = vpop.f32.mrb[7].mxu0 }
 0x16f   :  { %v318_v57 = vpack.c.bf16 %v272_v56, %v269_v53 }
 0x171   :  { %2938 = vmatprep.mubr.bf16.mxu1 %v318_v57 }
 0x172   :  { %2939 = vmatmul.mubr.bf16.gmra.mrb[4].mxu1 %v319_v55 }
 0x173   :  { %v2912_v58 = vpop.f32.mrb[8].mxu0 }
 0x174   :  { %v285_v59 = vpop.f32.mrb[9].mxu0 }
 0x175   :  { %v2913_v60 = vpop.f32.mrb[10].mxu0 }
 0x176   :  { %v321_v61 = vpack.c.bf16 %v2913_v60, %v2912_v58  ;;  %v288_v62 = vpop.f32.mrb[11].mxu0 }
 0x177   :  { %v320_v63 = vpack.c.bf16 %v288_v62, %v285_v59 }
 0x179   :  { %2942 = vmatprep.mubr.bf16.mxu1 %v320_v63 }
 0x17a   :  { %2943 = vmatmul.mubr.bf16.gmra.mrb[8].mxu1 %v321_v61 }
 0x17b   :  { %v2916_v0 = vpop.f32.mrb[12].mxu0 }
 0x17c   :  { %v301_v1 = vpop.f32.mrb[13].mxu0 }
 0x17d   :  { %v2917_v2 = vpop.f32.mrb[14].mxu0 }
 0x17e   :  { %v323_v3 = vpack.c.bf16 %v2917_v2, %v2916_v0  ;;  %v304_v4 = vpop.f32.mrb[15].mxu0 }
 0x17f   :  { %v322_v5 = vpack.c.bf16 %v304_v4, %v301_v1 }
 0x181   :  { %2946 = vmatprep.mubr.bf16.mxu1 %v322_v5 }
 0x182   :  { %2947 = vmatmul.mubr.bf16.gmra.mrb[12].mxu1 %v323_v3 }
 0x183   :  { %2998 = vmatprep.mubr.bf16.mxu1 %v3798_v11 }
 0x23d   :  { %v2936_v9 = vpop.f32.mrb[0].mxu1 }
 0x23e   :  { %v438_v10 = vadd.f32 %v2936_v9, %v2569_v8  ;;  %v429_v12 = vpop.f32.mrb[1].mxu1  ;;  %v3382_v9 = vld [vmem:[#allocation7 + $0x40] sm:$0xff]  }
 0x23f   :  { %v430_v13 = vadd.f32 %v2569_v8, %v429_v12  ;;  %v2937_v14 = vpop.f32.mrb[2].mxu1  ;;  %3014 = vmatprep.subr.bf16.mxu0 %v3382_v9  ;;  %v3384_v12 = vld [vmem:[#allocation7 + $0x50] sm:$0xff]  }
 0x240   :  { %v441_v15 = vadd.f32 %v2937_v14, %v2569_v8  ;;  %v432_v16 = vpop.f32.mrb[3].mxu1  ;;  %v494_v18 = vmax.f32 %v438_v10, 0.0  ;;  %v3383_v10 = vld [vmem:[#allocation7 + $0x48] sm:$0xff]  }
 0x241   :  { %v433_v17 = vadd.f32 %v2569_v8, %v432_v16  ;;  %v492_v19 = vmax.f32 %v430_v13, 0.0  ;;  %v3385_v13 = vld [vmem:[#allocation7 + $0x58] sm:$0xff]   ;;  %v3387_v14 = vld [vmem:[#allocation7 + $0x68] sm:$0xff]   ;;  %v3829_v16 = vld [vmem:[%s4141_s5] ss:$0 sm:$0xff] }
 0x242   :  { %v495_v11 = vmax.f32 %v441_v15, 0.0  ;;  %v3388_v15 = vld [vmem:[#allocation7 + $0x70] sm:$0xff]  }
 0x243   :  { %v493_v20 = vmax.f32 %v433_v17, 0.0 }
 0x244   :  { %v509_v21 = vpack.c.bf16 %v495_v11, %v494_v18 }
 0x245   :  { %v508_v22 = vpack.c.bf16 %v493_v20, %v492_v19  ;;  %v2940_v23 = vpop.f32.mrb[4].mxu1  ;;  %v3835_v19 = vld [vmem:[%s4142_s6] ss:$0 sm:$0xff] }
 0x246   :  { %v454_v24 = vadd.f32 %v2940_v23, %v2569_v8  ;;  %v445_v25 = vpop.f32.mrb[5].mxu1 }
 0x247   :  { %v446_v26 = vadd.f32 %v2569_v8, %v445_v25  ;;  %v2941_v27 = vpop.f32.mrb[6].mxu1  ;;  %2966 = vmatprep.mubr.bf16.mxu0 %v508_v22 }
 0x248   :  { %v457_v28 = vadd.f32 %v2941_v27, %v2569_v8  ;;  %v448_v29 = vpop.f32.mrb[7].mxu1  ;;  %2967 = vmatmul.mubr.bf16.vlgmr.msra.gmra.mrb[16].mxu0 %v509_v21  ;;  %v498_v33 = vmax.f32 %v454_v24, 0.0 }
 0x249   :  { %v449_v30 = vadd.f32 %v2569_v8, %v448_v29  ;;  %v496_v40 = vmax.f32 %v446_v26, 0.0  ;;  %3015 = vmatpush3.bf16.msra.mxu0 %v3382_v9  ;;  %v3844_v29 = vld [vmem:[%s4143_s7] ss:$0 sm:$0xff] }
 0x24a   :  { %v499_v39 = vmax.f32 %v457_v28, 0.0  ;;  %3016 = vmatprep.subr.bf16.mxu0 %v3383_v10 }
 0x24b   :  { %v497_v41 = vmax.f32 %v449_v30, 0.0 }
 0x24c   :  { %v511_v42 = vpack.c.bf16 %v499_v39, %v498_v33 }
 0x24d   :  { %v510_v43 = vpack.c.bf16 %v497_v41, %v496_v40  ;;  %v2944_v44 = vpop.f32.mrb[8].mxu1  ;;  %3017 = vmatpush3.bf16.msra.mxu0 %v3383_v10 }
 0x24e   :  { %v470_v45 = vadd.f32 %v2944_v44, %v2569_v8  ;;  %v461_v46 = vpop.f32.mrb[9].mxu1  ;;  %3018 = vmatprep.subr.bf16.mxu0 %v3384_v12 }
 0x24f   :  { %v462_v47 = vadd.f32 %v2569_v8, %v461_v46  ;;  %v2945_v48 = vpop.f32.mrb[10].mxu1  ;;  %2970 = vmatprep.mubr.bf16.mxu0 %v510_v43 }
 0x250   :  { %v473_v49 = vadd.f32 %v2945_v48, %v2569_v8  ;;  %v464_v50 = vpop.f32.mrb[11].mxu1  ;;  %2971 = vmatmul.mubr.bf16.gmra.mrb[20].mxu0 %v511_v42  ;;  %v502_v52 = vmax.f32 %v470_v45, 0.0 }
 0x251   :  { %v465_v51 = vadd.f32 %v2569_v8, %v464_v50  ;;  %v500_v54 = vmax.f32 %v462_v47, 0.0  ;;  %3019 = vmatpush3.bf16.msra.mxu0 %v3384_v12 }
 0x252   :  { %v503_v53 = vmax.f32 %v473_v49, 0.0  ;;  %3020 = vmatprep.subr.bf16.mxu0 %v3385_v13 }
 0x253   :  { %v501_v55 = vmax.f32 %v465_v51, 0.0 }
 0x254   :  { %v513_v56 = vpack.c.bf16 %v503_v53, %v502_v52 }
 0x255   :  { %v512_v57 = vpack.c.bf16 %v501_v55, %v500_v54  ;;  %v2948_v58 = vpop.f32.mrb[12].mxu1  ;;  %3021 = vmatpush3.bf16.msra.mxu0 %v3385_v13 }
 0x256   :  { %v486_v59 = vadd.f32 %v2948_v58, %v2569_v8  ;;  %v477_v60 = vpop.f32.mrb[13].mxu1 }
 0x257   :  { %v478_v61 = vadd.f32 %v2569_v8, %v477_v60  ;;  %v2949_v62 = vpop.f32.mrb[14].mxu1  ;;  %2974 = vmatprep.mubr.bf16.mxu0 %v512_v57 }
 0x258   :  { %v489_v63 = vadd.f32 %v2949_v62, %v2569_v8  ;;  %v480_v0 = vpop.f32.mrb[15].mxu1  ;;  %2975 = vmatmul.mubr.bf16.gmra.mrb[24].mxu0 %v513_v56  ;;  %v506_v2 = vmax.f32 %v486_v59, 0.0 }
 0x259   :  { %v481_v1 = vadd.f32 %v2569_v8, %v480_v0  ;;  %v504_v4 = vmax.f32 %v478_v61, 0.0  ;;  %v3386_v8 = vld [vmem:[#allocation7 + $0x60] sm:$0xff]  }
 0x25a   :  { %v507_v3 = vmax.f32 %v489_v63, 0.0  ;;  %3022 = vmatprep.subr.bf16.mxu0 %v3386_v8 }
 0x25b   :  { %v505_v5 = vmax.f32 %v481_v1, 0.0  ;;  %3023 = vmatpush3.bf16.msra.mxu0 %v3386_v8 }
 0x25c   :  { %v515_v6 = vpack.c.bf16 %v507_v3, %v506_v2  ;;  %3024 = vmatprep.subr.bf16.mxu0 %v3387_v14 }
 0x25d   :  { %v514_v7 = vpack.c.bf16 %v505_v5, %v504_v4 }
 0x25f   :  { %2978 = vmatprep.mubr.bf16.mxu0 %v514_v7  ;;  %3025 = vmatpush3.bf16.msra.mxu0 %v3387_v14 }
 0x260   :  { %2979 = vmatmul.mubr.bf16.gmra.mrb[28].mxu0 %v515_v6  ;;  %3026 = vmatprep.subr.bf16.mxu0 %v3388_v15 }
 0x263   :  { %3027 = vmatpush3.bf16.msra.mxu0 %v3388_v15 }
 0x31b   :  { %v2968_v17 = vpop.f32.mrb[16].mxu0 }
 0x31c   :  { %v630_v18 = vadd.f32 %v2968_v17, %v3829_v16  ;;  %v621_v11 = vpop.f32.mrb[17].mxu0 }
 0x31d   :  { %v622_v20 = vadd.f32 %v3829_v16, %v621_v11  ;;  %v2969_v21 = vpop.f32.mrb[18].mxu0 }
 0x31e   :  { %v686_v22 = vmax.f32 %v630_v18, 0.0  ;;  %v633_v23 = vadd.f32 %v2969_v21, %v3829_v16  ;;  %v624_v24 = vpop.f32.mrb[19].mxu0 }
 0x31f   :  { %v684_v25 = vmax.f32 %v622_v20, 0.0  ;;  %v625_v26 = vadd.f32 %v3829_v16, %v624_v24 }
 0x320   :  { %v709_v27 = vmul.f32 %v3835_v19, %v686_v22  ;;  %v687_v28 = vmax.f32 %v633_v23, 0.0 }
 0x321   :  { %v707_v30 = vmul.f32 %v3835_v19, %v684_v25  ;;  %v685_v33 = vmax.f32 %v625_v26, 0.0 }
 0x322   :  { %v710_v39 = vmul.f32 %v3835_v19, %v687_v28  ;;  %v732_v42 = vadd.f32 %v3844_v29, %v709_v27 }
 0x323   :  { %v708_v40 = vmul.f32 %v3835_v19, %v685_v33  ;;  %v2972_v41 = vpop.f32.mrb[20].mxu0  ;;  %v730_v46 = vadd.f32 %v3844_v29, %v707_v30 }
 0x324   :  { %v733_v43 = vadd.f32 %v3844_v29, %v710_v39  ;;  %v646_v44 = vadd.f32 %v2972_v41, %v3829_v16  ;;  %v637_v45 = vpop.f32.mrb[21].mxu0 }
 0x325   :  { %v731_v47 = vadd.f32 %v3844_v29, %v708_v40  ;;  %v638_v48 = vadd.f32 %v3829_v16, %v637_v45  ;;  %v2973_v49 = vpop.f32.mrb[22].mxu0 }
 0x326   :  { %v690_v50 = vmax.f32 %v646_v44, 0.0  ;;  %v649_v51 = vadd.f32 %v2973_v49, %v3829_v16  ;;  %v640_v52 = vpop.f32.mrb[23].mxu0  ;;  %v3856_v53 = vpack.c.bf16 %v733_v43, %v732_v42 }
 0x327   :  { %v688_v54 = vmax.f32 %v638_v48, 0.0  ;;  %v641_v55 = vadd.f32 %v3829_v16, %v640_v52  ;;  %v3859_v56 = vpack.c.bf16 %v731_v47, %v730_v46 }
 0x328   :  { %v713_v57 = vmul.f32 %v3835_v19, %v690_v50  ;;  %v691_v58 = vmax.f32 %v649_v51, 0.0 }
 0x329   :  { %v711_v59 = vmul.f32 %v3835_v19, %v688_v54  ;;  %v689_v60 = vmax.f32 %v641_v55, 0.0  ;;  %2982 = vmatprep.subr.bf16.mxu1 %v3859_v56 }
 0x32a   :  { %v714_v61 = vmul.f32 %v3835_v19, %v691_v58  ;;  %2983 = vmatpush3.bf16.msra.mxu1 %v3859_v56  ;;  %v736_v0 = vadd.f32 %v3844_v29, %v713_v57 }
 0x32b   :  { %v712_v62 = vmul.f32 %v3835_v19, %v689_v60  ;;  %v2976_v63 = vpop.f32.mrb[24].mxu0  ;;  %2984 = vmatprep.subr.bf16.mxu1 %v3856_v53  ;;  %v734_v4 = vadd.f32 %v3844_v29, %v711_v59  ;;  %v3391_v60 = vld [vmem:[#allocation8 + $0x48] sm:$0xff]  }
 0x32c   :  { %v737_v1 = vadd.f32 %v3844_v29, %v714_v61  ;;  %v662_v2 = vadd.f32 %v2976_v63, %v3829_v16  ;;  %v653_v3 = vpop.f32.mrb[25].mxu0 }
 0x32d   :  { %v735_v5 = vadd.f32 %v3844_v29, %v712_v62  ;;  %v654_v6 = vadd.f32 %v3829_v16, %v653_v3  ;;  %v2977_v7 = vpop.f32.mrb[26].mxu0 }
 0x32e   :  { %v694_v9 = vmax.f32 %v662_v2, 0.0  ;;  %v665_v10 = vadd.f32 %v2977_v7, %v3829_v16  ;;  %v656_v12 = vpop.f32.mrb[27].mxu0  ;;  %2985 = vmatpush3.bf16.msra.mxu1 %v3856_v53  ;;  %v3876_v13 = vpack.c.bf16 %v737_v1, %v736_v0 }
 0x32f   :  { %v692_v8 = vmax.f32 %v654_v6, 0.0  ;;  %v657_v14 = vadd.f32 %v3829_v16, %v656_v12  ;;  %v3879_v15 = vpack.c.bf16 %v735_v5, %v734_v4 }
 0x330   :  { %v717_v17 = vmul.f32 %v3835_v19, %v694_v9  ;;  %v695_v18 = vmax.f32 %v665_v10, 0.0 }
 0x331   :  { %v715_v11 = vmul.f32 %v3835_v19, %v692_v8  ;;  %v693_v20 = vmax.f32 %v657_v14, 0.0  ;;  %2986 = vmatprep.subr.bf16.mxu1 %v3879_v15 }
 0x332   :  { %v718_v21 = vmul.f32 %v3835_v19, %v695_v18  ;;  %2987 = vmatpush3.bf16.msra.mxu1 %v3879_v15  ;;  %v740_v24 = vadd.f32 %v3844_v29, %v717_v17 }
 0x333   :  { %v716_v22 = vmul.f32 %v3835_v19, %v693_v20  ;;  %v2980_v23 = vpop.f32.mrb[28].mxu0  ;;  %2988 = vmatprep.subr.bf16.mxu1 %v3876_v13  ;;  %v738_v28 = vadd.f32 %v3844_v29, %v715_v11 }
 0x334   :  { %v741_v25 = vadd.f32 %v3844_v29, %v718_v21  ;;  %v678_v26 = vadd.f32 %v2980_v23, %v3829_v16  ;;  %v669_v27 = vpop.f32.mrb[29].mxu0  ;;  %v3397_v23 = vld [vmem:[#allocation8 + $0x78] sm:$0xff]  }
 0x335   :  { %v739_v30 = vadd.f32 %v3844_v29, %v716_v22  ;;  %v670_v33 = vadd.f32 %v3829_v16, %v669_v27  ;;  %v2981_v39 = vpop.f32.mrb[30].mxu0  ;;  %v3396_v22 = vld [vmem:[#allocation8 + $0x70] sm:$0xff]   ;;  %v3401_v27 = vld [vmem:[#allocation10 + $0x58] sm:$0xff]  }
 0x336   :  { %v698_v40 = vmax.f32 %v678_v26, 0.0  ;;  %v681_v41 = vadd.f32 %v2981_v39, %v3829_v16  ;;  %v672_v42 = vpop.f32.mrb[31].mxu0  ;;  %2989 = vmatpush3.bf16.msra.mxu1 %v3876_v13  ;;  %v3896_v43 = vpack.c.bf16 %v741_v25, %v740_v24  ;;  %v3398_v24 = vld [vmem:[#allocation10 + $0x40] sm:$0xff]   ;;  %v3399_v25 = vld [vmem:[#allocation10 + $0x48] sm:$0xff]   ;;  %v3400_v26 = vld [vmem:[#allocation10 + $0x50] sm:$0xff]  }
 0x337   :  { %v696_v44 = vmax.f32 %v670_v33, 0.0  ;;  %v673_v45 = vadd.f32 %v3829_v16, %v672_v42  ;;  %v3899_v46 = vpack.c.bf16 %v739_v30, %v738_v28  ;;  %v3402_v28 = vld [vmem:[#allocation10 + $0x60] sm:$0xff]  }
 0x338   :  { %v721_v47 = vmul.f32 %v3835_v19, %v698_v40  ;;  %v699_v48 = vmax.f32 %v681_v41, 0.0  ;;  %v2590_v30 = vld [vmem:[%s4139_s3 + $0x1] ss:$0 sm:$0xff] }
 0x339   :  { %v719_v49 = vmul.f32 %v3835_v19, %v696_v44  ;;  %v697_v50 = vmax.f32 %v673_v45, 0.0  ;;  %2990 = vmatprep.subr.bf16.mxu1 %v3899_v46 }
 0x33a   :  { %v722_v51 = vmul.f32 %v3835_v19, %v699_v48  ;;  %2991 = vmatpush3.bf16.msra.mxu1 %v3899_v46  ;;  %v744_v16 = vadd.f32 %v3844_v29, %v721_v47 }
 0x33b   :  { %v720_v52 = vmul.f32 %v3835_v19, %v697_v50  ;;  %2992 = vmatprep.subr.bf16.mxu1 %v3896_v43  ;;  %v742_v55 = vadd.f32 %v3844_v29, %v719_v49  ;;  %v3389_v19 = vld [vmem:[#allocation7 + $0x78] sm:$0xff]  }
 0x33c   :  { %v745_v54 = vadd.f32 %v3844_v29, %v722_v51  ;;  %3028 = vmatprep.subr.bf16.mxu0 %v3389_v19 }
 0x33d   :  { %v743_v57 = vadd.f32 %v3844_v29, %v720_v52  ;;  %3029 = vmatpush3.bf16.msra.mxu0 %v3389_v19  ;;  %v3390_v29 = vld [vmem:[#allocation8 + $0x40] sm:$0xff]  }
 0x33e   :  { %2993 = vmatpush3.bf16.msra.mxu1 %v3896_v43  ;;  %v3913_v58 = vpack.c.bf16 %v745_v54, %v744_v16  ;;  %3078 = vmatprep.subr.bf16.mxu0 %v3398_v24 }
 0x33f   :  { %v3915_v59 = vpack.c.bf16 %v743_v57, %v742_v55 }
 0x341   :  { %2994 = vmatprep.subr.bf16.mxu1 %v3915_v59 }
 0x342   :  { %2995 = vmatpush3.bf16.msra.mxu1 %v3915_v59 }
 0x343   :  { %2996 = vmatprep.subr.bf16.mxu1 %v3913_v58 }
 0x346   :  { %2997 = vmatpush3.bf16.msra.mxu1 %v3913_v58 }
 0x347   :  { %3046 = vmatprep.subr.bf16.mxu1 %v3390_v29 }
 0x349   :  { %2999 = vmatmul.mubr.bf16.vlgmr.msra.gmra.mrb[16].mxu1 %v3801_v31  ;;  %v3392_v31 = vld [vmem:[#allocation8 + $0x50] sm:$0xff]  }
 0x34a   :  { %3002 = vmatprep.mubr.bf16.mxu1 %v3803_v32  ;;  %3047 = vmatpush3.bf16.msra.mxu1 %v3390_v29  ;;  %v3393_v32 = vld [vmem:[#allocation8 + $0x58] sm:$0xff]  }
 0x34b   :  { %3048 = vmatprep.subr.bf16.mxu1 %v3391_v60 }
 0x34e   :  { %3049 = vmatpush3.bf16.msra.mxu1 %v3391_v60 }
 0x34f   :  { %3050 = vmatprep.subr.bf16.mxu1 %v3392_v31 }
 0x351   :  { %3003 = vmatmul.mubr.bf16.gmra.mrb[20].mxu1 %v3807_v34  ;;  %v3394_v34 = vld [vmem:[#allocation8 + $0x60] sm:$0xff]  }
 0x352   :  { %3006 = vmatprep.mubr.bf16.mxu1 %v3809_v35  ;;  %3051 = vmatpush3.bf16.msra.mxu1 %v3392_v31  ;;  %v3395_v35 = vld [vmem:[#allocation8 + $0x68] sm:$0xff]  }
 0x353   :  { %3052 = vmatprep.subr.bf16.mxu1 %v3393_v32 }
 0x356   :  { %3053 = vmatpush3.bf16.msra.mxu1 %v3393_v32 }
 0x357   :  { %3054 = vmatprep.subr.bf16.mxu1 %v3394_v34 }
 0x359   :  { %3007 = vmatmul.mubr.bf16.gmra.mrb[24].mxu1 %v3813_v36 }
 0x35a   :  { %3010 = vmatprep.mubr.bf16.mxu1 %v3815_v37  ;;  %3055 = vmatpush3.bf16.msra.mxu1 %v3394_v34 }
 0x35b   :  { %3056 = vmatprep.subr.bf16.mxu1 %v3395_v35 }
 0x35e   :  { %3057 = vmatpush3.bf16.msra.mxu1 %v3395_v35 }
 0x35f   :  { %3058 = vmatprep.subr.bf16.mxu1 %v3396_v22 }
 0x361   :  { %3011 = vmatmul.mubr.bf16.gmra.mrb[28].mxu1 %v3819_v38 }
 0x362   :  { %3059 = vmatpush3.bf16.msra.mxu1 %v3396_v22 }
 0x363   :  { %3060 = vmatprep.subr.bf16.mxu1 %v3397_v23 }
 0x366   :  { %3061 = vmatpush3.bf16.msra.mxu1 %v3397_v23 }
 0x41c   :  { %v3000_v36 = vpop.f32.mrb[16].mxu1 }
 0x41d   :  { %v804_v37 = vpop.f32.mrb[17].mxu1 }
 0x41e   :  { %v3001_v38 = vpop.f32.mrb[18].mxu1 }
 0x41f   :  { %v868_v61 = vpack.c.bf16 %v3001_v38, %v3000_v36  ;;  %v807_v62 = vpop.f32.mrb[19].mxu1 }
 0x420   :  { %v867_v63 = vpack.c.bf16 %v807_v62, %v804_v37 }
 0x422   :  { %3030 = vmatprep.mubr.bf16.mxu0 %v867_v63 }
 0x423   :  { %3031 = vmatmul.mubr.bf16.vlgmr.msra.gmra.mrb[32].mxu0 %v868_v61 }
 0x424   :  { %v3004_v0 = vpop.f32.mrb[20].mxu1  ;;  %3079 = vmatpush3.bf16.msra.mxu0 %v3398_v24 }
 0x425   :  { %v820_v1 = vpop.f32.mrb[21].mxu1  ;;  %3080 = vmatprep.subr.bf16.mxu0 %v3399_v25 }
 0x426   :  { %v3005_v2 = vpop.f32.mrb[22].mxu1 }
 0x427   :  { %v870_v3 = vpack.c.bf16 %v3005_v2, %v3004_v0  ;;  %v823_v4 = vpop.f32.mrb[23].mxu1 }
 0x428   :  { %v869_v5 = vpack.c.bf16 %v823_v4, %v820_v1  ;;  %3081 = vmatpush3.bf16.msra.mxu0 %v3399_v25 }
 0x429   :  { %3082 = vmatprep.subr.bf16.mxu0 %v3400_v26 }
 0x42a   :  { %3034 = vmatprep.mubr.bf16.mxu0 %v869_v5 }
 0x42b   :  { %3035 = vmatmul.mubr.bf16.gmra.mrb[36].mxu0 %v870_v3 }
 0x42c   :  { %v3008_v6 = vpop.f32.mrb[24].mxu1  ;;  %3083 = vmatpush3.bf16.msra.mxu0 %v3400_v26 }
 0x42d   :  { %v836_v7 = vpop.f32.mrb[25].mxu1  ;;  %3084 = vmatprep.subr.bf16.mxu0 %v3401_v27 }
 0x42e   :  { %v3009_v9 = vpop.f32.mrb[26].mxu1 }
 0x42f   :  { %v872_v10 = vpack.c.bf16 %v3009_v9, %v3008_v6  ;;  %v839_v12 = vpop.f32.mrb[27].mxu1 }
 0x430   :  { %v871_v8 = vpack.c.bf16 %v839_v12, %v836_v7  ;;  %3085 = vmatpush3.bf16.msra.mxu0 %v3401_v27 }
 0x431   :  { %3086 = vmatprep.subr.bf16.mxu0 %v3402_v28 }
 0x432   :  { %3038 = vmatprep.mubr.bf16.mxu0 %v871_v8 }
 0x433   :  { %3039 = vmatmul.mubr.bf16.gmra.mrb[40].mxu0 %v872_v10 }
 0x434   :  { %v3012_v14 = vpop.f32.mrb[28].mxu1  ;;  %3087 = vmatpush3.bf16.msra.mxu0 %v3402_v28 }
 0x435   :  { %v852_v17 = vpop.f32.mrb[29].mxu1 }
 0x436   :  { %v3013_v18 = vpop.f32.mrb[30].mxu1 }
 0x437   :  { %v874_v11 = vpack.c.bf16 %v3013_v18, %v3012_v14  ;;  %v855_v20 = vpop.f32.mrb[31].mxu1 }
 0x438   :  { %v873_v21 = vpack.c.bf16 %v855_v20, %v852_v17 }
 0x43a   :  { %3042 = vmatprep.mubr.bf16.mxu0 %v873_v21 }
 0x43b   :  { %3043 = vmatmul.mubr.bf16.gmra.mrb[44].mxu0 %v874_v11 }
 0x4f6   :  { %v3032_v33 = vpop.f32.mrb[32].mxu0 }
 0x4f7   :  { %v991_v39 = vadd.f32 %v3032_v33, %v2590_v30  ;;  %v982_v40 = vpop.f32.mrb[33].mxu0 }
 0x4f8   :  { %v983_v41 = vadd.f32 %v2590_v30, %v982_v40  ;;  %v3033_v42 = vpop.f32.mrb[34].mxu0  ;;  %v3403_v40 = vld [vmem:[#allocation10 + $0x68] sm:$0xff]  }
 0x4f9   :  { %v994_v44 = vadd.f32 %v3033_v42, %v2590_v30  ;;  %v985_v45 = vpop.f32.mrb[35].mxu0  ;;  %v1047_v48 = vmax.f32 %v991_v39, 0.0  ;;  %v3446_v39 = vld [vmem:[#allocation2] sm:$0xff]   ;;  %3088 = vmatprep.subr.bf16.mxu0 %v3403_v40  ;;  %v3405_v42 = vld [vmem:[#allocation10 + $0x78] sm:$0xff]  }
 0x4fa   :  { %v986_v47 = vadd.f32 %v2590_v30, %v985_v45  ;;  %v1045_v50 = vmax.f32 %v983_v41, 0.0  ;;  %3089 = vmatpush3.bf16.msra.mxu0 %v3403_v40  ;;  %v3404_v41 = vld [vmem:[#allocation10 + $0x70] sm:$0xff]  }
 0x4fb   :  { %v1048_v49 = vmax.f32 %v994_v44, 0.0  ;;  %3090 = vmatprep.subr.bf16.mxu0 %v3404_v41  ;;  %v3934_v44 = vld [vmem:[%s4141_s5 + $0x1] ss:$0 sm:$0xff] }
 0x4fc   :  { %v1046_v51 = vmax.f32 %v986_v47, 0.0 }
 0x4fd   :  { %v1062_v52 = vpack.c.bf16 %v1048_v49, %v1047_v48  ;;  %v3940_v49 = vld [vmem:[%s4142_s6 + $0x1] ss:$0 sm:$0xff] }
 0x4fe   :  { %v1061_v16 = vpack.c.bf16 %v1046_v51, %v1045_v50  ;;  %v3036_v54 = vpop.f32.mrb[36].mxu0  ;;  %3091 = vmatpush3.bf16.msra.mxu0 %v3404_v41 }
 0x4ff   :  { %v1007_v55 = vadd.f32 %v3036_v54, %v2590_v30  ;;  %v998_v57 = vpop.f32.mrb[37].mxu0  ;;  %3092 = vmatprep.subr.bf16.mxu0 %v3405_v42 }
 0x500   :  { %v999_v19 = vadd.f32 %v2590_v30, %v998_v57  ;;  %v3037_v29 = vpop.f32.mrb[38].mxu0  ;;  %3062 = vmatprep.mubr.bf16.mxu1 %v1061_v16 }
 0x501   :  { %v1010_v60 = vadd.f32 %v3037_v29, %v2590_v30  ;;  %v1001_v31 = vpop.f32.mrb[39].mxu0  ;;  %3063 = vmatmul.mubr.bf16.vlgmr.msra.gmra.mrb[32].mxu1 %v1062_v52  ;;  %v1051_v34 = vmax.f32 %v1007_v55, 0.0 }
 0x502   :  { %v1002_v32 = vadd.f32 %v2590_v30, %v1001_v31  ;;  %v1049_v36 = vmax.f32 %v999_v19, 0.0  ;;  %3093 = vmatpush3.bf16.msra.mxu0 %v3405_v42 }
 0x503   :  { %v1052_v35 = vmax.f32 %v1010_v60, 0.0  ;;  %v3949_v60 = vld [vmem:[%s4143_s7 + $0x1] ss:$0 sm:$0xff] }
 0x504   :  { %v1050_v37 = vmax.f32 %v1002_v32, 0.0 }
 0x505   :  { %v1064_v38 = vpack.c.bf16 %v1052_v35, %v1051_v34 }
 0x506   :  { %v1063_v61 = vpack.c.bf16 %v1050_v37, %v1049_v36  ;;  %v3040_v62 = vpop.f32.mrb[40].mxu0 }
 0x507   :  { %v1023_v63 = vadd.f32 %v3040_v62, %v2590_v30  ;;  %v1014_v0 = vpop.f32.mrb[41].mxu0 }
 0x508   :  { %v1015_v1 = vadd.f32 %v2590_v30, %v1014_v0  ;;  %v3041_v2 = vpop.f32.mrb[42].mxu0  ;;  %3066 = vmatprep.mubr.bf16.mxu1 %v1063_v61 }
 0x509   :  { %v1026_v3 = vadd.f32 %v3041_v2, %v2590_v30  ;;  %v1017_v4 = vpop.f32.mrb[43].mxu0  ;;  %3067 = vmatmul.mubr.bf16.gmra.mrb[36].mxu1 %v1064_v38  ;;  %v1055_v6 = vmax.f32 %v1023_v63, 0.0 }
 0x50a   :  { %v1018_v5 = vadd.f32 %v2590_v30, %v1017_v4  ;;  %v1053_v9 = vmax.f32 %v1015_v1, 0.0 }
 0x50b   :  { %v1056_v7 = vmax.f32 %v1026_v3, 0.0 }
 0x50c   :  { %v1054_v10 = vmax.f32 %v1018_v5, 0.0 }
 0x50d   :  { %v1066_v12 = vpack.c.bf16 %v1056_v7, %v1055_v6 }
 0x50e   :  { %v1065_v8 = vpack.c.bf16 %v1054_v10, %v1053_v9  ;;  %v3044_v14 = vpop.f32.mrb[44].mxu0 }
 0x50f   :  { %v1039_v17 = vadd.f32 %v3044_v14, %v2590_v30  ;;  %v1030_v18 = vpop.f32.mrb[45].mxu0  ;;  %v3407_v14 = vld [vmem:[#allocation10 + $0x8] sm:$0xff]  }
 0x510   :  { %v1031_v11 = vadd.f32 %v2590_v30, %v1030_v18  ;;  %v3045_v20 = vpop.f32.mrb[46].mxu0  ;;  %3070 = vmatprep.mubr.bf16.mxu1 %v1065_v8 }
 0x511   :  { %v1042_v21 = vadd.f32 %v3045_v20, %v2590_v30  ;;  %v1033_v22 = vpop.f32.mrb[47].mxu0  ;;  %3071 = vmatmul.mubr.bf16.gmra.mrb[40].mxu1 %v1066_v12  ;;  %v1059_v24 = vmax.f32 %v1039_v17, 0.0 }
 0x512   :  { %v1034_v23 = vadd.f32 %v2590_v30, %v1033_v22  ;;  %v1057_v26 = vmax.f32 %v1031_v11, 0.0  ;;  %v3406_v30 = vld [vmem:[#allocation10] sm:$0xff]  }
 0x513   :  { %v1060_v25 = vmax.f32 %v1042_v21, 0.0  ;;  %3110 = vmatprep.subr.bf16.mxu0 %v3406_v30 }
 0x514   :  { %v1058_v27 = vmax.f32 %v1034_v23, 0.0 }
 0x515   :  { %v1068_v28 = vpack.c.bf16 %v1060_v25, %v1059_v24 }
 0x516   :  { %v1067_v33 = vpack.c.bf16 %v1058_v27, %v1057_v26  ;;  %v3408_v26 = vld [vmem:[#allocation10 + $0x10] sm:$0xff]  }
 0x518   :  { %3074 = vmatprep.mubr.bf16.mxu1 %v1067_v33 }
 0x519   :  { %3075 = vmatmul.mubr.bf16.gmra.mrb[44].mxu1 %v1068_v28 }
 0x51a   :  { %3158 = vmatprep.mubr.bf16.mxu1 %v3446_v39 }
 0x5d4   :  { %v3064_v45 = vpop.f32.mrb[32].mxu1 }
 0x5d5   :  { %v1185_v47 = vadd.f32 %v3064_v45, %v3934_v44  ;;  %v1176_v48 = vpop.f32.mrb[33].mxu1 }
 0x5d6   :  { %v1177_v50 = vadd.f32 %v3934_v44, %v1176_v48  ;;  %v3065_v51 = vpop.f32.mrb[34].mxu1 }
 0x5d7   :  { %v1241_v52 = vmax.f32 %v1185_v47, 0.0  ;;  %v1188_v16 = vadd.f32 %v3065_v51, %v3934_v44  ;;  %v1179_v54 = vpop.f32.mrb[35].mxu1 }
 0x5d8   :  { %v1239_v55 = vmax.f32 %v1177_v50, 0.0  ;;  %v1180_v57 = vadd.f32 %v3934_v44, %v1179_v54 }
 0x5d9   :  { %v1265_v19 = vmul.f32 %v3940_v49, %v1241_v52  ;;  %v1242_v29 = vmax.f32 %v1188_v16, 0.0  ;;  %v3409_v52 = vld [vmem:[#allocation10 + $0x18] sm:$0xff]  }
 0x5da   :  { %v1263_v31 = vmul.f32 %v3940_v49, %v1239_v55  ;;  %v1240_v32 = vmax.f32 %v1180_v57, 0.0 }
 0x5db   :  { %v1266_v34 = vmul.f32 %v3940_v49, %v1242_v29  ;;  %v1289_v37 = vadd.f32 %v3949_v60, %v1265_v19 }
 0x5dc   :  { %v1264_v35 = vmul.f32 %v3940_v49, %v1240_v32  ;;  %v3068_v36 = vpop.f32.mrb[36].mxu1  ;;  %v1287_v63 = vadd.f32 %v3949_v60, %v1263_v31 }
 0x5dd   :  { %v1290_v38 = vadd.f32 %v3949_v60, %v1266_v34  ;;  %v1201_v61 = vadd.f32 %v3068_v36, %v3934_v44  ;;  %v1192_v62 = vpop.f32.mrb[37].mxu1 }
 0x5de   :  { %v1288_v0 = vadd.f32 %v3949_v60, %v1264_v35  ;;  %v1193_v1 = vadd.f32 %v3934_v44, %v1192_v62  ;;  %v3069_v2 = vpop.f32.mrb[38].mxu1  ;;  %v3410_v35 = vld [vmem:[#allocation10 + $0x20] sm:$0xff]  }
 0x5df   :  { %v1304_v3 = vpack.c.bf16 %v1290_v38, %v1289_v37  ;;  %v1245_v4 = vmax.f32 %v1201_v61, 0.0  ;;  %v1204_v5 = vadd.f32 %v3069_v2, %v3934_v44  ;;  %v1195_v6 = vpop.f32.mrb[39].mxu1 }
 0x5e0   :  { %v1243_v7 = vmax.f32 %v1193_v1, 0.0  ;;  %v1196_v9 = vadd.f32 %v3934_v44, %v1195_v6  ;;  %v1303_v10 = vpack.c.bf16 %v1288_v0, %v1287_v63 }
 0x5e1   :  { %v1269_v12 = vmul.f32 %v3940_v49, %v1245_v4  ;;  %v1246_v8 = vmax.f32 %v1204_v5, 0.0 }
 0x5e2   :  { %v1267_v17 = vmul.f32 %v3940_v49, %v1243_v7  ;;  %v1244_v18 = vmax.f32 %v1196_v9, 0.0  ;;  %3094 = vmatprep.mubr.bf16.mxu0 %v1303_v10  ;;  %3142 = vmatprep.subr.bf16.mxu1 %v1303_v10  ;;  %v3411_v7 = vld [vmem:[#allocation10 + $0x28] sm:$0xff]  }
 0x5e3   :  { %v1270_v11 = vmul.f32 %v3940_v49, %v1246_v8  ;;  %3095 = vmatmul.mubr.bf16.vlgmr.msra.gmra.mrb[48].mxu0 %v1304_v3  ;;  %3143 = vmatpush3.bf16.msra.mxu1 %v1303_v10  ;;  %v1293_v22 = vadd.f32 %v3949_v60, %v1269_v12 }
 0x5e4   :  { %v1268_v20 = vmul.f32 %v3940_v49, %v1244_v18  ;;  %v3072_v21 = vpop.f32.mrb[40].mxu1  ;;  %3111 = vmatpush3.bf16.msra.mxu0 %v3406_v30  ;;  %3144 = vmatprep.subr.bf16.mxu1 %v1304_v3  ;;  %v1291_v27 = vadd.f32 %v3949_v60, %v1267_v17  ;;  %v3412_v17 = vld [vmem:[#allocation10 + $0x30] sm:$0xff]  }
 0x5e5   :  { %v1294_v23 = vadd.f32 %v3949_v60, %v1270_v11  ;;  %v1217_v24 = vadd.f32 %v3072_v21, %v3934_v44  ;;  %v1208_v25 = vpop.f32.mrb[41].mxu1  ;;  %3112 = vmatprep.subr.bf16.mxu0 %v3407_v14 }
 0x5e6   :  { %v1292_v28 = vadd.f32 %v3949_v60, %v1268_v20  ;;  %v1209_v33 = vadd.f32 %v3934_v44, %v1208_v25  ;;  %v3073_v39 = vpop.f32.mrb[42].mxu1  ;;  %v3416_v25 = vld [vmem:[#allocation7 + $0x90] sm:$0xff]  }
 0x5e7   :  { %v1249_v40 = vmax.f32 %v1217_v24, 0.0  ;;  %v1220_v41 = vadd.f32 %v3073_v39, %v3934_v44  ;;  %v1211_v42 = vpop.f32.mrb[43].mxu1  ;;  %3145 = vmatpush3.bf16.msra.mxu1 %v1304_v3  ;;  %v1306_v30 = vpack.c.bf16 %v1294_v23, %v1293_v22  ;;  %v3413_v22 = vld [vmem:[#allocation10 + $0x38] sm:$0xff]   ;;  %v3447_v23 = vld [vmem:[#allocation2 + $0x8] sm:$0xff]   ;;  %v3448_v24 = vld [vmem:[#allocation2 + $0x10] sm:$0xff]  }
 0x5e8   :  { %v1247_v45 = vmax.f32 %v1209_v33, 0.0  ;;  %v1212_v47 = vadd.f32 %v3934_v44, %v1211_v42  ;;  %3113 = vmatpush3.bf16.msra.mxu0 %v3407_v14  ;;  %v1305_v48 = vpack.c.bf16 %v1292_v28, %v1291_v27  ;;  %v3450_v27 = vld [vmem:[#allocation2 + $0x20] sm:$0xff]   ;;  %v3451_v28 = vld [vmem:[#allocation2 + $0x28] sm:$0xff]   ;;  %v3452_v33 = vld [vmem:[#allocation2 + $0x30] sm:$0xff]  }
 0x5e9   :  { %v1273_v50 = vmul.f32 %v3940_v49, %v1249_v40  ;;  %v1250_v51 = vmax.f32 %v1220_v41, 0.0  ;;  %3114 = vmatprep.subr.bf16.mxu0 %v3408_v26  ;;  %v3421_v39 = vld [vmem:[#allocation7 + $0xb8] sm:$0xff]   ;;  %v3422_v40 = vld [vmem:[#allocation8 + $0x80] sm:$0xff]   ;;  %v3423_v41 = vld [vmem:[#allocation8 + $0x88] sm:$0xff]  }
 0x5ea   :  { %v1271_v16 = vmul.f32 %v3940_v49, %v1247_v45  ;;  %v1248_v54 = vmax.f32 %v1212_v47, 0.0  ;;  %3098 = vmatprep.mubr.bf16.mxu0 %v1305_v48  ;;  %3146 = vmatprep.subr.bf16.mxu1 %v1305_v48  ;;  %v3426_v42 = vld [vmem:[#allocation8 + $0xa0] sm:$0xff]  }
 0x5eb   :  { %v1274_v55 = vmul.f32 %v3940_v49, %v1250_v51  ;;  %3099 = vmatmul.mubr.bf16.gmra.mrb[52].mxu0 %v1306_v30  ;;  %3147 = vmatpush3.bf16.msra.mxu1 %v1305_v48  ;;  %v1297_v29 = vadd.f32 %v3949_v60, %v1273_v50 }
 0x5ec   :  { %v1272_v57 = vmul.f32 %v3940_v49, %v1248_v54  ;;  %v3076_v19 = vpop.f32.mrb[44].mxu1  ;;  %3115 = vmatpush3.bf16.msra.mxu0 %v3408_v26  ;;  %3148 = vmatprep.subr.bf16.mxu1 %v1306_v30  ;;  %v1295_v36 = vadd.f32 %v3949_v60, %v1271_v16  ;;  %v3449_v26 = vld [vmem:[#allocation2 + $0x18] sm:$0xff]  }
 0x5ed   :  { %v1298_v31 = vadd.f32 %v3949_v60, %v1274_v55  ;;  %v1233_v32 = vadd.f32 %v3076_v19, %v3934_v44  ;;  %v1224_v34 = vpop.f32.mrb[45].mxu1  ;;  %3116 = vmatprep.subr.bf16.mxu0 %v3409_v52 }
 0x5ee   :  { %v1296_v37 = vadd.f32 %v3949_v60, %v1272_v57  ;;  %v1225_v38 = vadd.f32 %v3934_v44, %v1224_v34  ;;  %v3077_v61 = vpop.f32.mrb[46].mxu1 }
 0x5ef   :  { %v1253_v62 = vmax.f32 %v1233_v32, 0.0  ;;  %v1236_v63 = vadd.f32 %v3077_v61, %v3934_v44  ;;  %v1227_v0 = vpop.f32.mrb[47].mxu1  ;;  %3149 = vmatpush3.bf16.msra.mxu1 %v1306_v30  ;;  %v1308_v1 = vpack.c.bf16 %v1298_v31, %v1297_v29  ;;  %v3427_v30 = vld [vmem:[#allocation8 + $0xa8] sm:$0xff]  }
 0x5f0   :  { %v1251_v2 = vmax.f32 %v1225_v38, 0.0  ;;  %v1228_v3 = vadd.f32 %v3934_v44, %v1227_v0  ;;  %3117 = vmatpush3.bf16.msra.mxu0 %v3409_v52  ;;  %v1307_v4 = vpack.c.bf16 %v1296_v37, %v1295_v36 }
 0x5f1   :  { %v1277_v5 = vmul.f32 %v3940_v49, %v1253_v62  ;;  %v1254_v6 = vmax.f32 %v1236_v63, 0.0  ;;  %3118 = vmatprep.subr.bf16.mxu0 %v3410_v35 }
 0x5f2   :  { %v1275_v9 = vmul.f32 %v3940_v49, %v1251_v2  ;;  %v1252_v10 = vmax.f32 %v1228_v3, 0.0  ;;  %3102 = vmatprep.mubr.bf16.mxu0 %v1307_v4  ;;  %3150 = vmatprep.subr.bf16.mxu1 %v1307_v4  ;;  %v3429_v2 = vld [vmem:[#allocation8 + $0xb8] sm:$0xff]   ;;  %v3430_v3 = vld [vmem:[#allocation10 + $0x80] sm:$0xff]  }
 0x5f3   :  { %v1278_v12 = vmul.f32 %v3940_v49, %v1254_v6  ;;  %3103 = vmatmul.mubr.bf16.gmra.mrb[56].mxu0 %v1308_v1  ;;  %3151 = vmatpush3.bf16.msra.mxu1 %v1307_v4  ;;  %v1301_v44 = vadd.f32 %v3949_v60, %v1277_v5  ;;  %v4005_v4 = vld [vmem:[%s4139_s3 + $0x2] ss:$0 sm:$0xff] }
 0x5f4   :  { %v1276_v8 = vmul.f32 %v3940_v49, %v1252_v10  ;;  %3119 = vmatpush3.bf16.msra.mxu0 %v3410_v35  ;;  %3152 = vmatprep.subr.bf16.mxu1 %v1308_v1  ;;  %v1299_v18 = vadd.f32 %v3949_v60, %v1275_v9  ;;  %v3414_v49 = vld [vmem:[#allocation7 + $0x80] sm:$0xff]  }
 0x5f5   :  { %v1302_v14 = vadd.f32 %v3949_v60, %v1278_v12  ;;  %3120 = vmatprep.subr.bf16.mxu0 %v3411_v7 }
 0x5f6   :  { %v1300_v11 = vadd.f32 %v3949_v60, %v1276_v8  ;;  %v3415_v60 = vld [vmem:[#allocation7 + $0x88] sm:$0xff]  }
 0x5f7   :  { %3153 = vmatpush3.bf16.msra.mxu1 %v1308_v1  ;;  %v1310_v20 = vpack.c.bf16 %v1302_v14, %v1301_v44  ;;  %v3428_v1 = vld [vmem:[#allocation8 + $0xb0] sm:$0xff]  }
 0x5f8   :  { %3121 = vmatpush3.bf16.msra.mxu0 %v3411_v7  ;;  %v1309_v21 = vpack.c.bf16 %v1300_v11, %v1299_v18 }
 0x5f9   :  { %3122 = vmatprep.subr.bf16.mxu0 %v3412_v17 }
 0x5fa   :  { %3106 = vmatprep.mubr.bf16.mxu0 %v1309_v21  ;;  %3154 = vmatprep.subr.bf16.mxu1 %v1309_v21 }
 0x5fb   :  { %3107 = vmatmul.mubr.bf16.gmra.mrb[60].mxu0 %v1310_v20  ;;  %3155 = vmatpush3.bf16.msra.mxu1 %v1309_v21 }
 0x5fc   :  { %3123 = vmatpush3.bf16.msra.mxu0 %v3412_v17  ;;  %3126 = vmatprep.mubr.bf16.mxu0 %v3859_v56  ;;  %v3417_v56 = vld [vmem:[#allocation7 + $0x98] sm:$0xff]  }
 0x5fd   :  { %3156 = vmatprep.subr.bf16.mxu1 %v1310_v20  ;;  %3124 = vmatprep.subr.bf16.mxu0 %v3413_v22 }
 0x5ff   :  { %3157 = vmatpush3.bf16.msra.mxu1 %v1310_v20 }
 0x600   :  { %3125 = vmatpush3.bf16.msra.mxu0 %v3413_v22  ;;  %3174 = vmatprep.subr.bf16.mxu1 %v3414_v49 }
 0x601   :  { %3206 = vmatprep.subr.bf16.mxu0 %v3422_v40 }
 0x602   :  { %3159 = vmatmul.mubr.bf16.vlgmr.msra.gmra.mrb[48].mxu1 %v3447_v23  ;;  %v3431_v23 = vld [vmem:[#allocation10 + $0x88] sm:$0xff]  }
 0x603   :  { %3127 = vmatmul.mubr.bf16.vlgmr.msra.gmra.mrb[48].mxu0 %v3856_v53  ;;  %3162 = vmatprep.mubr.bf16.mxu1 %v3448_v24  ;;  %v3418_v53 = vld [vmem:[#allocation7 + $0xa0] sm:$0xff]  }
 0x604   :  { %3130 = vmatprep.mubr.bf16.mxu0 %v3879_v15  ;;  %3175 = vmatpush3.bf16.msra.mxu1 %v3414_v49  ;;  %v3419_v15 = vld [vmem:[#allocation7 + $0xa8] sm:$0xff]  }
 0x605   :  { %3176 = vmatprep.subr.bf16.mxu1 %v3415_v60  ;;  %3207 = vmatpush3.bf16.msra.mxu0 %v3422_v40 }
 0x606   :  { %3208 = vmatprep.subr.bf16.mxu0 %v3423_v41 }
 0x608   :  { %3177 = vmatpush3.bf16.msra.mxu1 %v3415_v60 }
 0x609   :  { %3178 = vmatprep.subr.bf16.mxu1 %v3416_v25  ;;  %3209 = vmatpush3.bf16.msra.mxu0 %v3423_v41 }
 0x60a   :  { %3163 = vmatmul.mubr.bf16.gmra.mrb[52].mxu1 %v3449_v26 }
 0x60b   :  { %3131 = vmatmul.mubr.bf16.gmra.mrb[52].mxu0 %v3876_v13  ;;  %3166 = vmatprep.mubr.bf16.mxu1 %v3450_v27  ;;  %v3420_v13 = vld [vmem:[#allocation7 + $0xb0] sm:$0xff]  }
 0x60c   :  { %3134 = vmatprep.mubr.bf16.mxu0 %v3899_v46  ;;  %3179 = vmatpush3.bf16.msra.mxu1 %v3416_v25  ;;  %v3453_v46 = vld [vmem:[#allocation2 + $0x38] sm:$0xff]  }
 0x60d   :  { %3180 = vmatprep.subr.bf16.mxu1 %v3417_v56 }
 0x610   :  { %3181 = vmatpush3.bf16.msra.mxu1 %v3417_v56 }
 0x611   :  { %3182 = vmatprep.subr.bf16.mxu1 %v3418_v53 }
 0x612   :  { %3167 = vmatmul.mubr.bf16.gmra.mrb[56].mxu1 %v3451_v28  ;;  %v3432_v28 = vld [vmem:[#allocation10 + $0x90] sm:$0xff]  }
 0x613   :  { %3135 = vmatmul.mubr.bf16.gmra.mrb[56].mxu0 %v3896_v43  ;;  %3170 = vmatprep.mubr.bf16.mxu1 %v3452_v33  ;;  %v3424_v43 = vld [vmem:[#allocation8 + $0x90] sm:$0xff]  }
 0x614   :  { %3138 = vmatprep.mubr.bf16.mxu0 %v3915_v59  ;;  %3183 = vmatpush3.bf16.msra.mxu1 %v3418_v53  ;;  %v3425_v59 = vld [vmem:[#allocation8 + $0x98] sm:$0xff]  }
 0x615   :  { %3184 = vmatprep.subr.bf16.mxu1 %v3419_v15  ;;  %3210 = vmatprep.subr.bf16.mxu0 %v3424_v43 }
 0x616   :  { %3211 = vmatpush3.bf16.msra.mxu0 %v3424_v43 }
 0x617   :  { %3212 = vmatprep.subr.bf16.mxu0 %v3425_v59 }
 0x618   :  { %3185 = vmatpush3.bf16.msra.mxu1 %v3419_v15 }
 0x619   :  { %3186 = vmatprep.subr.bf16.mxu1 %v3420_v13 }
 0x61a   :  { %3171 = vmatmul.mubr.bf16.gmra.mrb[60].mxu1 %v3453_v46  ;;  %3213 = vmatpush3.bf16.msra.mxu0 %v3425_v59  ;;  %v3433_v59 = vld [vmem:[#allocation10 + $0x98] sm:$0xff]  }
 0x61b   :  { %3139 = vmatmul.mubr.bf16.gmra.mrb[60].mxu0 %v3913_v58  ;;  %3214 = vmatprep.subr.bf16.mxu0 %v3426_v42 }
 0x61c   :  { %3187 = vmatpush3.bf16.msra.mxu1 %v3420_v13 }
 0x61d   :  { %3188 = vmatprep.subr.bf16.mxu1 %v3421_v39 }
 0x61e   :  { %3215 = vmatpush3.bf16.msra.mxu0 %v3426_v42 }
 0x61f   :  { %3216 = vmatprep.subr.bf16.mxu0 %v3427_v30 }
 0x620   :  { %3189 = vmatpush3.bf16.msra.mxu1 %v3421_v39 }
 0x622   :  { %3217 = vmatpush3.bf16.msra.mxu0 %v3427_v30 }
 0x623   :  { %3218 = vmatprep.subr.bf16.mxu0 %v3428_v1 }
 0x626   :  { %3219 = vmatpush3.bf16.msra.mxu0 %v3428_v1  ;;  %v3435_v1 = vld [vmem:[#allocation10 + $0xa8] sm:$0xff]  }
 0x627   :  { %3220 = vmatprep.subr.bf16.mxu0 %v3429_v2 }
 0x62a   :  { %3221 = vmatpush3.bf16.msra.mxu0 %v3429_v2  ;;  %v3436_v2 = vld [vmem:[#allocation10 + $0xb0] sm:$0xff]  }
 0x62b   :  { %3238 = vmatprep.subr.bf16.mxu0 %v3430_v3 }
 0x6d5   :  { %v3160_v58 = vpop.f32.mrb[48].mxu1 }
 0x6d6   :  { %v1652_v45 = vpop.f32.mrb[49].mxu1 }
 0x6d7   :  { %v3161_v47 = vpop.f32.mrb[50].mxu1 }
 0x6d8   :  { %v1716_v48 = vpack.c.bf16 %v3161_v47, %v3160_v58  ;;  %v1655_v50 = vpop.f32.mrb[51].mxu1 }
 0x6d9   :  { %v1715_v51 = vpack.c.bf16 %v1655_v50, %v1652_v45 }
 0x6db   :  { %3190 = vmatprep.mubr.bf16.mxu1 %v1715_v51  ;;  %v3434_v51 = vld [vmem:[#allocation10 + $0xa0] sm:$0xff]  }
 0x6dc   :  { %3191 = vmatmul.mubr.bf16.vlgmr.msra.gmra.mrb[64].mxu1 %v1716_v48 }
 0x6dd   :  { %v3164_v52 = vpop.f32.mrb[52].mxu1 }
 0x6de   :  { %v1668_v16 = vpop.f32.mrb[53].mxu1 }
 0x6df   :  { %v3165_v54 = vpop.f32.mrb[54].mxu1 }
 0x6e0   :  { %v1718_v55 = vpack.c.bf16 %v3165_v54, %v3164_v52  ;;  %v1671_v57 = vpop.f32.mrb[55].mxu1 }
 0x6e1   :  { %v1717_v19 = vpack.c.bf16 %v1671_v57, %v1668_v16 }
 0x6e3   :  { %3194 = vmatprep.mubr.bf16.mxu1 %v1717_v19 }
 0x6e4   :  { %3195 = vmatmul.mubr.bf16.gmra.mrb[68].mxu1 %v1718_v55 }
 0x6e5   :  { %v3168_v29 = vpop.f32.mrb[56].mxu1 }
 0x6e6   :  { %v1684_v31 = vpop.f32.mrb[57].mxu1 }
 0x6e7   :  { %v3169_v32 = vpop.f32.mrb[58].mxu1 }
 0x6e8   :  { %v1720_v34 = vpack.c.bf16 %v3169_v32, %v3168_v29  ;;  %v1687_v35 = vpop.f32.mrb[59].mxu1 }
 0x6e9   :  { %v1719_v36 = vpack.c.bf16 %v1687_v35, %v1684_v31 }
 0x6eb   :  { %3198 = vmatprep.mubr.bf16.mxu1 %v1719_v36 }
 0x6ec   :  { %3199 = vmatmul.mubr.bf16.gmra.mrb[72].mxu1 %v1720_v34 }
 0x6ed   :  { %v3172_v37 = vpop.f32.mrb[60].mxu1 }
 0x6ee   :  { %v1700_v38 = vpop.f32.mrb[61].mxu1 }
 0x6ef   :  { %v3173_v61 = vpop.f32.mrb[62].mxu1 }
 0x6f0   :  { %v1722_v62 = vpack.c.bf16 %v3173_v61, %v3172_v37  ;;  %v1703_v63 = vpop.f32.mrb[63].mxu1 }
 0x6f1   :  { %v1721_v0 = vpack.c.bf16 %v1703_v63, %v1700_v38 }
 0x6f3   :  { %3202 = vmatprep.mubr.bf16.mxu1 %v1721_v0 }
 0x6f4   :  { %3203 = vmatmul.mubr.bf16.gmra.mrb[76].mxu1 %v1722_v62 }
 0x7af   :  { %v3192_v5 = vpop.f32.mrb[64].mxu1 }
 0x7b0   :  { %v1839_v6 = vadd.f32 %v3192_v5, %v4005_v4  ;;  %v1830_v7 = vpop.f32.mrb[65].mxu1 }
 0x7b1   :  { %v1831_v9 = vadd.f32 %v4005_v4, %v1830_v7  ;;  %v3193_v10 = vpop.f32.mrb[66].mxu1 }
 0x7b2   :  { %v1842_v12 = vadd.f32 %v3193_v10, %v4005_v4  ;;  %v1833_v8 = vpop.f32.mrb[67].mxu1  ;;  %v1895_v14 = vmax.f32 %v1839_v6, 0.0 }
 0x7b3   :  { %v1834_v44 = vadd.f32 %v4005_v4, %v1833_v8  ;;  %v1893_v18 = vmax.f32 %v1831_v9, 0.0  ;;  %v4032_v9 = vld [vmem:[%s4142_s6 + $0x2] ss:$0 sm:$0xff] }
 0x7b4   :  { %v1896_v17 = vmax.f32 %v1842_v12, 0.0 }
 0x7b5   :  { %v1894_v11 = vmax.f32 %v1834_v44, 0.0 }
 0x7b6   :  { %v1910_v20 = vpack.c.bf16 %v1896_v17, %v1895_v14 }
 0x7b7   :  { %v1909_v21 = vpack.c.bf16 %v1894_v11, %v1893_v18  ;;  %v3196_v22 = vpop.f32.mrb[68].mxu1 }
 0x7b8   :  { %v1855_v49 = vadd.f32 %v3196_v22, %v4005_v4  ;;  %v1846_v60 = vpop.f32.mrb[69].mxu1 }
 0x7b9   :  { %v1847_v24 = vadd.f32 %v4005_v4, %v1846_v60  ;;  %v3197_v25 = vpop.f32.mrb[70].mxu1  ;;  %3222 = vmatprep.mubr.bf16.mxu0 %v1909_v21  ;;  %v4041_v21 = vld [vmem:[%s4143_s7 + $0x2] ss:$0 sm:$0xff] }
 0x7ba   :  { %v1858_v56 = vadd.f32 %v3197_v25, %v4005_v4  ;;  %v1849_v26 = vpop.f32.mrb[71].mxu1  ;;  %3223 = vmatmul.mubr.bf16.vlgmr.msra.gmra.mrb[64].mxu0 %v1910_v20  ;;  %v1899_v53 = vmax.f32 %v1855_v49, 0.0 }
 0x7bb   :  { %v1850_v27 = vadd.f32 %v4005_v4, %v1849_v26  ;;  %3239 = vmatpush3.bf16.msra.mxu0 %v3430_v3  ;;  %v1897_v33 = vmax.f32 %v1847_v24, 0.0  ;;  %v3437_v3 = vld [vmem:[#allocation10 + $0xb8] sm:$0xff]  }
 0x7bc   :  { %v1900_v15 = vmax.f32 %v1858_v56, 0.0  ;;  %3240 = vmatprep.subr.bf16.mxu0 %v3431_v23 }
 0x7bd   :  { %v1898_v13 = vmax.f32 %v1850_v27, 0.0 }
 0x7be   :  { %v1912_v46 = vpack.c.bf16 %v1900_v15, %v1899_v53 }
 0x7bf   :  { %v1911_v39 = vpack.c.bf16 %v1898_v13, %v1897_v33  ;;  %v3200_v40 = vpop.f32.mrb[72].mxu1  ;;  %3241 = vmatpush3.bf16.msra.mxu0 %v3431_v23 }
 0x7c0   :  { %v1871_v41 = vadd.f32 %v3200_v40, %v4005_v4  ;;  %v1862_v43 = vpop.f32.mrb[73].mxu1  ;;  %3242 = vmatprep.subr.bf16.mxu0 %v3432_v28 }
 0x7c1   :  { %v1863_v42 = vadd.f32 %v4005_v4, %v1862_v43  ;;  %v3201_v30 = vpop.f32.mrb[74].mxu1  ;;  %3226 = vmatprep.mubr.bf16.mxu0 %v1911_v39 }
 0x7c2   :  { %v1874_v58 = vadd.f32 %v3201_v30, %v4005_v4  ;;  %v1865_v45 = vpop.f32.mrb[75].mxu1  ;;  %3227 = vmatmul.mubr.bf16.gmra.mrb[68].mxu0 %v1912_v46  ;;  %v1903_v48 = vmax.f32 %v1871_v41, 0.0 }
 0x7c3   :  { %v1866_v47 = vadd.f32 %v4005_v4, %v1865_v45  ;;  %3243 = vmatpush3.bf16.msra.mxu0 %v3432_v28  ;;  %v1901_v52 = vmax.f32 %v1863_v42, 0.0 }
 0x7c4   :  { %v1904_v50 = vmax.f32 %v1874_v58, 0.0  ;;  %3244 = vmatprep.subr.bf16.mxu0 %v3433_v59 }
 0x7c5   :  { %v1902_v16 = vmax.f32 %v1866_v47, 0.0 }
 0x7c6   :  { %v1914_v54 = vpack.c.bf16 %v1904_v50, %v1903_v48 }
 0x7c7   :  { %v1913_v55 = vpack.c.bf16 %v1902_v16, %v1901_v52  ;;  %v3204_v57 = vpop.f32.mrb[76].mxu1  ;;  %3245 = vmatpush3.bf16.msra.mxu0 %v3433_v59 }
 0x7c8   :  { %v1887_v19 = vadd.f32 %v3204_v57, %v4005_v4  ;;  %v1878_v29 = vpop.f32.mrb[77].mxu1  ;;  %3246 = vmatprep.subr.bf16.mxu0 %v3434_v51 }
 0x7c9   :  { %v1879_v31 = vadd.f32 %v4005_v4, %v1878_v29  ;;  %v3205_v32 = vpop.f32.mrb[78].mxu1  ;;  %3230 = vmatprep.mubr.bf16.mxu0 %v1913_v55 }
 0x7ca   :  { %v1890_v34 = vadd.f32 %v3205_v32, %v4005_v4  ;;  %v1881_v35 = vpop.f32.mrb[79].mxu1  ;;  %3231 = vmatmul.mubr.bf16.gmra.mrb[72].mxu0 %v1914_v54  ;;  %v1907_v37 = vmax.f32 %v1887_v19, 0.0 }
 0x7cb   :  { %v1882_v36 = vadd.f32 %v4005_v4, %v1881_v35  ;;  %3247 = vmatpush3.bf16.msra.mxu0 %v3434_v51  ;;  %v1905_v61 = vmax.f32 %v1879_v31, 0.0  ;;  %v4026_v4 = vld [vmem:[%s4141_s5 + $0x2] ss:$0 sm:$0xff] }
 0x7cc   :  { %v1908_v38 = vmax.f32 %v1890_v34, 0.0  ;;  %3248 = vmatprep.subr.bf16.mxu0 %v3435_v1 }
 0x7cd   :  { %v1906_v62 = vmax.f32 %v1882_v36, 0.0 }
 0x7ce   :  { %v1916_v63 = vpack.c.bf16 %v1908_v38, %v1907_v37 }
 0x7cf   :  { %v1915_v0 = vpack.c.bf16 %v1906_v62, %v1905_v61  ;;  %3249 = vmatpush3.bf16.msra.mxu0 %v3435_v1 }
 0x7d0   :  { %3250 = vmatprep.subr.bf16.mxu0 %v3436_v2 }
 0x7d1   :  { %3234 = vmatprep.mubr.bf16.mxu0 %v1915_v0 }
 0x7d2   :  { %3235 = vmatmul.mubr.bf16.gmra.mrb[76].mxu0 %v1916_v63 }
 0x7d3   :  { %3251 = vmatpush3.bf16.msra.mxu0 %v3436_v2 }
 0x7d4   :  { %3252 = vmatprep.subr.bf16.mxu0 %v3437_v3 }
 0x7d7   :  { %3253 = vmatpush3.bf16.msra.mxu0 %v3437_v3 }
 0x88d   :  { %v3224_v5 = vpop.f32.mrb[64].mxu0 }
 0x88e   :  { %v2033_v6 = vadd.f32 %v3224_v5, %v4026_v4  ;;  %v2024_v7 = vpop.f32.mrb[65].mxu0 }
 0x88f   :  { %v2025_v10 = vadd.f32 %v4026_v4, %v2024_v7  ;;  %v3225_v12 = vpop.f32.mrb[66].mxu0 }
 0x890   :  { %v2089_v8 = vmax.f32 %v2033_v6, 0.0  ;;  %v2036_v44 = vadd.f32 %v3225_v12, %v4026_v4  ;;  %v2027_v14 = vpop.f32.mrb[67].mxu0 }
 0x891   :  { %v2087_v17 = vmax.f32 %v2025_v10, 0.0  ;;  %v2028_v18 = vadd.f32 %v4026_v4, %v2027_v14 }
 0x892   :  { %v2113_v11 = vmul.f32 %v4032_v9, %v2089_v8  ;;  %v2090_v20 = vmax.f32 %v2036_v44, 0.0 }
 0x893   :  { %v2111_v22 = vmul.f32 %v4032_v9, %v2087_v17  ;;  %v2088_v49 = vmax.f32 %v2028_v18, 0.0 }
 0x894   :  { %v2114_v60 = vmul.f32 %v4032_v9, %v2090_v20  ;;  %v2137_v25 = vadd.f32 %v4041_v21, %v2113_v11 }
 0x895   :  { %v2112_v23 = vmul.f32 %v4032_v9, %v2088_v49  ;;  %v3228_v24 = vpop.f32.mrb[68].mxu0  ;;  %v2135_v53 = vadd.f32 %v4041_v21, %v2111_v22 }
 0x896   :  { %v2138_v56 = vadd.f32 %v4041_v21, %v2114_v60  ;;  %v2049_v26 = vadd.f32 %v3228_v24, %v4026_v4  ;;  %v2040_v27 = vpop.f32.mrb[69].mxu0 }
 0x897   :  { %v2136_v15 = vadd.f32 %v4041_v21, %v2112_v23  ;;  %v2041_v28 = vadd.f32 %v4026_v4, %v2040_v27  ;;  %v3229_v33 = vpop.f32.mrb[70].mxu0 }
 0x898   :  { %v2152_v13 = vpack.c.bf16 %v2138_v56, %v2137_v25  ;;  %v2093_v46 = vmax.f32 %v2049_v26, 0.0  ;;  %v2052_v39 = vadd.f32 %v3229_v33, %v4026_v4  ;;  %v2043_v40 = vpop.f32.mrb[71].mxu0 }
 0x899   :  { %v2091_v41 = vmax.f32 %v2041_v28, 0.0  ;;  %v2044_v43 = vadd.f32 %v4026_v4, %v2043_v40  ;;  %v2151_v59 = vpack.c.bf16 %v2136_v15, %v2135_v53 }
 0x89a   :  { %v2117_v42 = vmul.f32 %v4032_v9, %v2093_v46  ;;  %v2094_v30 = vmax.f32 %v2052_v39, 0.0  ;;  %v3628_v46 = vmov 0.0   ;;  %v3630_v39 = vmov 0  }
 0x89b   :  { %v2115_v58 = vmul.f32 %v4032_v9, %v2091_v41  ;;  %v2092_v45 = vmax.f32 %v2044_v43, 0.0  ;;  %3254 = vmatprep.mubr.bf16.mxu0 %v2151_v59  ;;  %3270 = vmatprep.subr.bf16.mxu1 %v3628_v46 }
 0x89c   :  { %v2118_v47 = vmul.f32 %v4032_v9, %v2094_v30  ;;  %3255 = vmatmul.mubr.bf16.vlgmr.msra.gmra.mrb[48].mxu0 %v2152_v13  ;;  %v2141_v51 = vadd.f32 %v4041_v21, %v2117_v42  ;;  %3286 = vmatprep.mubr.msk.bf16.mxu1 %vm3629_vm0, %v3628_v46 }
 0x89d   :  { %v2116_v48 = vmul.f32 %v4032_v9, %v2092_v45  ;;  %v3232_v50 = vpop.f32.mrb[72].mxu0  ;;  %v2139_v55 = vadd.f32 %v4041_v21, %v2115_v58  ;;  %3357 = vset.pattern.permute.xlu0 %v3630_v39 }
 0x89e   :  { %v2142_v52 = vadd.f32 %v4041_v21, %v2118_v47  ;;  %v2065_v16 = vadd.f32 %v3232_v50, %v4026_v4  ;;  %v2056_v54 = vpop.f32.mrb[73].mxu0 }
 0x89f   :  { %v2140_v57 = vadd.f32 %v4041_v21, %v2116_v48  ;;  %v2057_v19 = vadd.f32 %v4026_v4, %v2056_v54  ;;  %v3233_v29 = vpop.f32.mrb[74].mxu0 }
 0x8a0   :  { %v2097_v31 = vmax.f32 %v2065_v16, 0.0  ;;  %v2068_v32 = vadd.f32 %v3233_v29, %v4026_v4  ;;  %v2059_v34 = vpop.f32.mrb[75].mxu0  ;;  %v2154_v35 = vpack.c.bf16 %v2142_v52, %v2141_v51 }
 0x8a1   :  { %v2095_v36 = vmax.f32 %v2057_v19, 0.0  ;;  %v2060_v37 = vadd.f32 %v4026_v4, %v2059_v34  ;;  %v2153_v38 = vpack.c.bf16 %v2140_v57, %v2139_v55  ;;  %v2337_v19 = vlaneseq }
 0x8a2   :  { %v2121_v61 = vmul.f32 %v4032_v9, %v2097_v31  ;;  %v2098_v62 = vmax.f32 %v2068_v32, 0.0 }
 0x8a3   :  { %v2119_v63 = vmul.f32 %v4032_v9, %v2095_v36  ;;  %v2096_v0 = vmax.f32 %v2060_v37, 0.0  ;;  %3258 = vmatprep.mubr.bf16.mxu0 %v2153_v38  ;;  %v2338_v31 = vshrl.u32 %v2337_v19, 7 }
 0x8a4   :  { %v2122_v1 = vmul.f32 %v4032_v9, %v2098_v62  ;;  %3259 = vmatmul.mubr.bf16.gmra.mrb[52].mxu0 %v2154_v35  ;;  %v2145_v5 = vadd.f32 %v4041_v21, %v2121_v61  ;;  %v2661_v62 = vld [vmem:[%s4148_s12] ss:$0 sm:$0xff] }
 0x8a5   :  { %v2120_v2 = vmul.f32 %v4032_v9, %v2096_v0  ;;  %v3236_v3 = vpop.f32.mrb[76].mxu0  ;;  %v2143_v12 = vadd.f32 %v4041_v21, %v2119_v63  ;;  %v2339_v38 = vadd.s32 8, %v2338_v31  ;;  %vm2345_vm1 = vcmp.eq.s32.totalorder %v2661_v62, %v2338_v31  ;;  %v3438_v63 = vld [vmem:[#allocation11] sm:$0xff]  }
 0x8a6   :  { %v2146_v6 = vadd.f32 %v4041_v21, %v2122_v1  ;;  %v2081_v7 = vadd.f32 %v3236_v3, %v4026_v4  ;;  %v2072_v10 = vpop.f32.mrb[77].mxu0  ;;  %v3631_v0 = vmov 1.0|1.0   ;;  %v3439_v1 = vld [vmem:[#allocation11 + $0x8] sm:$0xff]   ;;  %v3441_v3 = vld [vmem:[#allocation11 + $0x18] sm:$0xff]  }
 0x8a7   :  { %v2144_v8 = vadd.f32 %v4041_v21, %v2120_v2  ;;  %v2073_v44 = vadd.f32 %v4026_v4, %v2072_v10  ;;  %v3237_v14 = vpop.f32.mrb[78].mxu0  ;;  %vm2346_vm2 = vcmp.eq.s32.totalorder %v2661_v62, %v2339_v38  ;;  %v3440_v2 = vld [vmem:[#allocation11 + $0x10] sm:$0xff]   ;;  %v3445_v10 = vld [vmem:[#allocation11 + $0x38] sm:$0xff]  }
 0x8a8   :  { %v2101_v17 = vmax.f32 %v2081_v7, 0.0  ;;  %v2084_v18 = vadd.f32 %v3237_v14, %v4026_v4  ;;  %v2075_v11 = vpop.f32.mrb[79].mxu0  ;;  %v2156_v20 = vpack.c.bf16 %v2146_v6, %v2145_v5  ;;  %vm2664_vm3 = vmpackc.low %vm2346_vm2, %vm2345_vm1  ;;  %v3442_v5 = vld [vmem:[#allocation11 + $0x20] sm:$0xff]   ;;  %v3443_v6 = vld [vmem:[#allocation11 + $0x28] sm:$0xff]  }
 0x8a9   :  { %v2099_v22 = vmax.f32 %v2073_v44, 0.0  ;;  %v2076_v49 = vadd.f32 %v4026_v4, %v2075_v11  ;;  %v2155_v60 = vpack.c.bf16 %v2144_v8, %v2143_v12  ;;  %v3444_v7 = vld [vmem:[#allocation11 + $0x30] sm:$0xff]   ;;  %v2666_v44 = vld [vmem:[%s4145_s9] ss:$0 sm:$0xff]  ;;  %s3586_s9 = scalar_lea.vmem %s2547_s22, 256 }
 0x8aa   :  { %v2125_v23 = vmul.f32 %v4032_v9, %v2101_v17  ;;  %v2102_v24 = vmax.f32 %v2084_v18, 0.0  ;;  %p3587_p6 = scmp.ne.s32.totalorder %s2547_s22, %s3586_s9  ;;  %p3592_p8 = scmp.lt.s32.totalorder %s3586_s9, %s3586_s9 }
 0x8ab   :  { %v2123_v25 = vmul.f32 %v4032_v9, %v2099_v22  ;;  %v2100_v56 = vmax.f32 %v2076_v49, 0.0  ;;  %3262 = vmatprep.mubr.bf16.mxu0 %v2155_v60 }
 0x8ac   :  { %v2126_v26 = vmul.f32 %v4032_v9, %v2102_v24  ;;  %3263 = vmatmul.mubr.bf16.gmra.mrb[56].mxu0 %v2156_v20  ;;  %v2149_v53 = vadd.f32 %v4041_v21, %v2125_v23  ;;  %p3593_p9 = por %p3592_p8, %p3591_p7 }
 0x8ad   :  { %v2124_v27 = vmul.f32 %v4032_v9, %v2100_v56  ;;  %v2147_v28 = vadd.f32 %v4041_v21, %v2123_v25  ;;  %v2401_v9 = vld [vmem:[%s4149_s13] sm:$0xff] }
 0x8ae   :  { %v2150_v15 = vadd.f32 %v4041_v21, %v2126_v26  ;;  %2405 = vperm.xlu0 %3357, %v2401_v9   ;;  %v2667_v56 = vld [vmem:[%s4147_s11] ss:$0 sm:$0xff]  ;;  %p3594_p10 = pnand %p3593_p9, %p3587_p6 }
 0x8af   :  { %v2148_v4 = vadd.f32 %v4041_v21, %v2124_v27  ;;  %v2402_v21 = vld [vmem:[%s4149_s13 + $0x8] sm:$0xff] }
 0x8b0   :  { %v2158_v33 = vpack.c.bf16 %v2150_v15, %v2149_v53 }
 0x8b1   :  { %v2157_v13 = vpack.c.bf16 %v2148_v4, %v2147_v28 }
 0x8b2   :  { %2410 = vperm.xlu0 %3357, %v2402_v21  }
 0x8b3   :  { %3266 = vmatprep.mubr.bf16.mxu0 %v2157_v13 }
 0x8b4   :  { %3267 = vmatmul.mubr.bf16.gmra.mrb[60].mxu0 %v2158_v33 }
 0x92d   :  { %v2406_v12 = vpop.permute.xlu0 %2405 }
 0x931   :  { %v2411_v18 = vpop.permute.xlu0 %2410 }
 0x96f   :  { %v3256_v40 = vpop.f32.mrb[48].mxu0 }
 0x970   :  { %v2258_v41 = vpop.f32.mrb[49].mxu0 }
 0x971   :  { %v3257_v43 = vpop.f32.mrb[50].mxu0 }
 0x972   :  { %v2353_v59 = vpack.c.bf16 %v3257_v43, %v3256_v40  ;;  %v2261_v42 = vpop.f32.mrb[51].mxu0 }
 0x973   :  { %v2352_v30 = vpack.c.bf16 %v2261_v42, %v2258_v41 }
 0x975   :  { %3271 = vmatpush3.bf16.msra.mxu1 %v2352_v30 }
 0x976   :  { %3272 = vmatprep.subr.bf16.mxu1 %v3628_v46 }
 0x977   :  { %v3260_v58 = vpop.f32.mrb[52].mxu0 }
 0x978   :  { %v2274_v45 = vpop.f32.mrb[53].mxu0 }
 0x979   :  { %v3261_v47 = vpop.f32.mrb[54].mxu0  ;;  %3273 = vmatpush3.bf16.msra.mxu1 %v2353_v59 }
 0x97a   :  { %v2355_v48 = vpack.c.bf16 %v3261_v47, %v3260_v58  ;;  %v2277_v50 = vpop.f32.mrb[55].mxu0  ;;  %3274 = vmatprep.subr.bf16.mxu1 %v3628_v46 }
 0x97b   :  { %v2354_v51 = vpack.c.bf16 %v2277_v50, %v2274_v45 }
 0x97d   :  { %3275 = vmatpush3.bf16.msra.mxu1 %v2354_v51 }
 0x97e   :  { %3276 = vmatprep.subr.bf16.mxu1 %v3628_v46 }
 0x97f   :  { %v3264_v52 = vpop.f32.mrb[56].mxu0 }
 0x980   :  { %v2290_v16 = vpop.f32.mrb[57].mxu0 }
 0x981   :  { %v3265_v54 = vpop.f32.mrb[58].mxu0  ;;  %3277 = vmatpush3.bf16.msra.mxu1 %v2355_v48 }
 0x982   :  { %v2357_v55 = vpack.c.bf16 %v3265_v54, %v3264_v52  ;;  %v2293_v57 = vpop.f32.mrb[59].mxu0  ;;  %3278 = vmatprep.subr.bf16.mxu1 %v3628_v46 }
 0x983   :  { %v2356_v29 = vpack.c.bf16 %v2293_v57, %v2290_v16 }
 0x985   :  { %3279 = vmatpush3.bf16.msra.mxu1 %v2356_v29 }
 0x986   :  { %3280 = vmatprep.subr.bf16.mxu1 %v3628_v46 }
 0x987   :  { %v3268_v32 = vpop.f32.mrb[60].mxu0 }
 0x988   :  { %v2306_v34 = vpop.f32.mrb[61].mxu0 }
 0x989   :  { %v3269_v35 = vpop.f32.mrb[62].mxu0  ;;  %3281 = vmatpush3.bf16.msra.mxu1 %v2357_v55 }
 0x98a   :  { %v2359_v36 = vpack.c.bf16 %v3269_v35, %v3268_v32  ;;  %v2309_v37 = vpop.f32.mrb[63].mxu0  ;;  %3282 = vmatprep.subr.bf16.mxu1 %v3628_v46 }
 0x98b   :  { %v2358_v61 = vpack.c.bf16 %v2309_v37, %v2306_v34 }
 0x98d   :  { %3283 = vmatpush3.bf16.msra.mxu1 %v2358_v61 }
 0x98e   :  { %3284 = vmatprep.subr.bf16.mxu1 %v3628_v46 }
 0x991   :  { %3285 = vmatpush3.bf16.msra.mxu1 %v2359_v36 }
 0x992   :  { %3290 = vmatprep.subr.bf16.mxu1 %v3628_v46 }
 0x994   :  { %3287 = vmatmul.mubr.msk.bf16.vlgmr.msra.gmra.mrb[80].mxu1 %vm2664_vm3, %v3631_v0 }
 0x995   :  { %3291 = vmatpush3.bf16.msra.mxu1 %v3438_v63  ;;  %3306 = vmatprep.mubr.msk.bf16.mxu1 %vm3629_vm0, %v3628_v46 }
 0x996   :  { %3292 = vmatprep.subr.bf16.mxu1 %v3628_v46 }
 0x999   :  { %3293 = vmatpush3.bf16.msra.mxu1 %v3439_v1 }
 0x99a   :  { %3294 = vmatprep.subr.bf16.mxu1 %v3628_v46 }
 0x99d   :  { %3295 = vmatpush3.bf16.msra.mxu1 %v3440_v2 }
 0x99e   :  { %3296 = vmatprep.subr.bf16.mxu1 %v3628_v46 }
 0x9a1   :  { %3297 = vmatpush3.bf16.msra.mxu1 %v3441_v3 }
 0x9a2   :  { %3298 = vmatprep.subr.bf16.mxu1 %v3628_v46 }
 0x9a5   :  { %3299 = vmatpush3.bf16.msra.mxu1 %v3442_v5 }
 0x9a6   :  { %3300 = vmatprep.subr.bf16.mxu1 %v3628_v46 }
 0x9a9   :  { %3301 = vmatpush3.bf16.msra.mxu1 %v3443_v6 }
 0x9aa   :  { %3302 = vmatprep.subr.bf16.mxu1 %v3628_v46 }
 0x9ad   :  { %3303 = vmatpush3.bf16.msra.mxu1 %v3444_v7 }
 0x9ae   :  { %3304 = vmatprep.subr.bf16.mxu1 %v3628_v46 }
 0x9b1   :  { %3305 = vmatpush3.bf16.msra.mxu1 %v3445_v10 }
 0xa67   :  { %v2394_v8 = vpop.f32.mrb[80].mxu1 }
 0xa68   :  { %v2413_v14 = vmul.f32 %v2406_v12, %v2394_v8  ;;  %v3288_v17 = vpop.f32.mrb[81].mxu1 }
 0xa69   :  { %v2397_v11 = vpop.f32.mrb[82].mxu1 }
 0xa6a   :  { %v2422_v20 = vadd.f32 %v2666_v44, %v2413_v14  ;;  %v2414_v22 = vmul.f32 %v2411_v18, %v2397_v11  ;;  %v3289_v49 = vpop.f32.mrb[83].mxu1 }
 0xa6c   :  { %v2423_v60 = vadd.f32 %v2666_v44, %v2414_v22  ;;  %v2424_v23 = vmax.f32 %v2422_v20, 0.0 }
 0xa6e   :  { %v2425_v24 = vmax.f32 %v2423_v60, 0.0 }
 0xa70   :  { %v2426_v25 = vpack.c.bf16 %v2425_v24, %v2424_v23 }
 0xa72   :  { %3307 = vmatmul.mubr.bf16.vlgmr.msra.gmra.mrb[84].mxu1 %v2426_v25 }
 0xb45   :  { %v2532_v26 = vpop.f32.mrb[84].mxu1 }
 0xb46   :  { %v2533_v27 = vadd.f32 %v2667_v56, %v2532_v26  ;;  %v3308_v53 = vpop.f32.mrb[85].mxu1 }
 0xb47   :  { %v2535_v15 = vpop.f32.mrb[86].mxu1 }
 0xb48   :  { %2539 = vst [vmem:[#allocation13] sm:$0xff] %v2533_v27  ;;  %v2536_v28 = vadd.f32 %v2667_v56, %v2535_v15  ;;  %v3309_v4 = vpop.f32.mrb[87].mxu1 }
 0xb4a   :  { %2540 = vst [vmem:[#allocation13 + $0x8] sm:$0xff] %v2536_v28 }
 0xb4b   :  { %3597 = shalt.err (!%p3594_p10)
}
 0xb4c   :  { %s3598_s15 = scalar_lea.hbm %s4150_s14, 256 }
 0xb4d   :  { %p3599_p11 = scmp.ne.s32.totalorder %s4150_s14, %s3598_s15  ;;  %p3602_p12 = scmp.lt.u32.totalorder %s3598_s15, %s4150_s14 }
 0xb4f   :  { %p3604_p13 = pnand %p3602_p12, %p3599_p11 }
 0xb51   :  { %3607 = shalt.err (!%p3604_p13)
}
 0xb52   :  { %2552 = dma.vmem_to_hbm [thread:$0]  %s2547_s22, 256, %s4150_s14, [#allocation4], %s3619_s23, %s3619_s23, %s3620_s24  }
 0xb53   :  { %3616 = dma.done.wait [#allocation4], 256  }
 0xb54   :  { %3617 = vsyncadd [#allocation4], 4294967040 }
 0xb55   :  { %2556 = vsyncpa [#allocation3], 1 }
 0xb56   :  { %2557 = vsyncpa [#allocation6], 1 }
 0xb57   :  { %2558 = vsyncpa [#allocation9], 1 }
 0xb58   :  { %2559 = vsyncpa [#allocation12], 1 }
 0xb59   :  { %2560 = vsyncpa [#allocation4], 1 }

</bundles_post_ra>
